<compile_context>
chip_gen: v5e
topology: v5e:2x2
jax: 0.10.0
libtpu: 0.0.40
codegen_flags: <defaults>
</compile_context>

<pallas_src>
import functools

import jax
import jax.numpy as jnp
from jax.experimental import pallas as pl
from jax.experimental.pallas import tpu as pltpu


def _round_up(x, m):
    return ((x + m - 1) // m) * m


# ----------------------------------------------------------------------------
# Glue: PyG-style gcn_norm, scattered directly into a padded buffer
# ----------------------------------------------------------------------------
def gcn_norm_dense_padded(edge_index, edge_weight, num_nodes, rows_pad, cols_pad,
                          dtype=jnp.bfloat16):
    """Padded dense A_hat with A_hat[dst, src] = d^-1/2[src] * w * d^-1/2[dst],
    incl. self loops with weight 1 (PyG GCNConv defaults), built directly in `dtype`."""
    src = edge_index[0]
    dst = edge_index[1]
    loop = jnp.arange(num_nodes, dtype=src.dtype)
    src = jnp.concatenate([src, loop])
    dst = jnp.concatenate([dst, loop])
    w = jnp.concatenate([edge_weight, jnp.ones((num_nodes,), edge_weight.dtype)])
    deg = jnp.zeros((num_nodes,), w.dtype).at[dst].add(w)
    dinv = jnp.where(deg > 0, 1.0 / jnp.sqrt(deg), 0.0)
    norm = (dinv[src] * w * dinv[dst]).astype(dtype)
    return jnp.zeros((rows_pad, cols_pad), dtype).at[dst, src].add(norm)
    # TODO(synk): replace the dense O(N^2) A_hat with a block-sparse formulation
    # (PrefetchScalarGridSpec prefetching per-row-tile nonzero column-tile lists) for
    # realistic graph sizes; and try fp8 A on v7x / int8 A on v6e (watch underflow of
    # d^-1/2 * w * d^-1/2 for high-degree nodes).


# ----------------------------------------------------------------------------
# Pallas kernel: tiled A_hat @ XW_cat aggregation + fused MLP epilogue
# ----------------------------------------------------------------------------
def _gnn_kernel(a_ref, xw_ref, w1_ref, b1_ref, w2_ref, b2_ref, out_ref, acc_ref,
                *, tk, xw_resident):
    k = pl.program_id(1)

    @pl.when(k == 0)
    def _():
        acc_ref[...] = jnp.zeros_like(acc_ref)

    if xw_resident:
        # XW_cat is fully VMEM-resident: take the k-th tk-row chunk (no HBM restream).
        xw = xw_ref[pl.ds(pl.multiple_of(k * tk, tk), tk), :]
    else:
        xw = xw_ref[...]

    # Aggregation for BOTH GCN branches at once: bf16 operands, f32 MXU accumulation.
    acc_ref[...] += jnp.dot(a_ref[...], xw, preferred_element_type=jnp.float32)

    @pl.when(k == pl.num_programs(1) - 1)
    def _():
        # MLP: Linear(2H,128) + ReLU + Linear(128, 1 padded to 128), fused per row tile.
        # GCN biases are pre-folded into b1_ref (b1_eff) in the wrapper.
        h1 = jnp.dot(acc_ref[...].astype(jnp.bfloat16), w1_ref[...],
                     preferred_element_type=jnp.float32) + b1_ref[...]
        h1 = jnp.maximum(h1, 0.0)
        out_ref[...] = jnp.dot(h1.astype(jnp.bfloat16), w2_ref[...],
                               preferred_element_type=jnp.float32) + b2_ref[...]


def gnn_forward_pallas(user_x, movie_x, edge_index, edge_attr, params, *,
                       tm=512, tk=512, xw_resident_budget=4 << 20):
    """Forward pass of GNNRecommendationModel.

    Tile guidance: v5e/v6e -> tm,tk = 512..1024 (raise vmem_limit_bytes on v5e for the
    largest tiles); v7x -> tm = 256..512, tk = 512, keep rows_pad//tm >= 2 and even so
    the 'parallel' axis splits over both TensorCores.
    """
    n = user_x.shape[0]
    two_h = params["w1"].shape[0]      # 2 * hidden_dim
    mlp_h = params["w1"].shape[1]      # 128
    lane = 128                         # lane-dense output width

    # Effective tiles: clamp to the 128-rounded problem size (small graphs not inflated),
    # then pad rows / cols independently to multiples of their own tile.
    tm_eff = min(tm, _round_up(n, 128))
    tk_eff = min(tk, _round_up(n, 128))
    rows_pad = _round_up(n, tm_eff)
    cols_pad = _round_up(n, tk_eff)

    # A_hat built directly as a padded bf16 buffer (no extra f32 materialize+pad+cast pass).
    a_p = gcn_norm_dense_padded(edge_index, edge_attr, n, rows_pad, cols_pad,
                                dtype=jnp.bfloat16)

    # Hoisted tiny input projections (K=3 / K=18), branch fusion, and GCN-bias fold.
    xw = jnp.concatenate([user_x @ params["wu"], movie_x @ params["wm"]], axis=-1)
    bcat = jnp.concatenate([params["bu"], params["bm"]], axis=-1)
    b1_eff = params["b1"] + bcat @ params["w1"]          # exact in f32 (ReLU comes after)

    xw_p = jnp.zeros((cols_pad, two_h), jnp.bfloat16).at[:n, :].set(
        xw.astype(jnp.bfloat16))

    # MLP weights: bf16 operands (f32 accumulation in-kernel); pad the (128,1) head to
    # (128,128) so the output block is lane-dense (unmasked stores).
    w1_bf = params["w1"].astype(jnp.bfloat16)
    w2_pad = jnp.zeros((mlp_h, lane), jnp.bfloat16).at[:, :1].set(
        params["w2"].astype(jnp.bfloat16))
    b2_pad = jnp.zeros((1, lane), jnp.float32).at[:, :1].set(params["b2"])

    # XW_cat residency: constant-index block (fetched once) when it fits the budget;
    # otherwise stream (tk, 2H) tiles per reduction step.
    xw_resident = cols_pad * two_h * 2 <= xw_resident_budget
    if xw_resident:
        xw_spec = pl.BlockSpec((cols_pad, two_h), lambda i, k: (0, 0))
    else:
        xw_spec = pl.BlockSpec((tk_eff, two_h), lambda i, k: (k, 0))

    grid = (rows_pad // tm_eff, cols_pad // tk_eff)
    kernel = functools.partial(_gnn_kernel, tk=tk_eff, xw_resident=xw_resident)

    out = pl.pallas_call(
        kernel,
        out_shape=jax.ShapeDtypeStruct((rows_pad, lane), jnp.float32),
        grid_spec=pltpu.PrefetchScalarGridSpec(
            num_scalar_prefetch=0,
            grid=grid,
            in_specs=[
                pl.BlockSpec((tm_eff, tk_eff), lambda i, k: (i, k)),   # A_hat (streamed)
                xw_spec,                                               # fused XW_cat
                pl.BlockSpec((two_h, mlp_h), lambda i, k: (0, 0)),     # W1 (resident)
                pl.BlockSpec((1, mlp_h), lambda i, k: (0, 0)),         # b1_eff (resident)
                pl.BlockSpec((mlp_h, lane), lambda i, k: (0, 0)),      # padded W2 (resident)
                pl.BlockSpec((1, lane), lambda i, k: (0, 0)),          # padded b2 (resident)
            ],
            out_specs=pl.BlockSpec((tm_eff, lane), lambda i, k: (i, 0)),
            scratch_shapes=[pltpu.VMEM((tm_eff, two_h), jnp.float32)], # row-tile accumulator
        ),
        compiler_params=pltpu.CompilerParams(
            dimension_semantics=("parallel", "arbitrary")),
        # NOTE: for tm/tk >= 1024 on v5e (16 MiB default scoped VMEM) also pass
        # vmem_limit_bytes=...; at the default 512 tiles everything fits comfortably.
    )(a_p, xw_p, w1_bf, b1_eff, w2_pad, b2_pad)

    return out[:n, :1]


# ----------------------------------------------------------------------------
# Pure-JAX references (mirror PyTorch semantics) for correctness checks
# ----------------------------------------------------------------------------
def gnn_forward_ref(a_hat_f32, user_x, movie_x, params):
    xw = jnp.concatenate([user_x @ params["wu"], movie_x @ params["wm"]], axis=-1)
    bcat = jnp.concatenate([params["bu"], params["bm"]], axis=-1)
    hcat = a_hat_f32 @ xw + bcat
    h1 = jnp.maximum(hcat @ params["w1"] + params["b1"], 0.0)
    return h1 @ params["w2"] + params["b2"]


def gnn_forward_ref_quant(a_hat_bf16, user_x, movie_x, params):
    """Reference with the same bf16 operands / f32 accumulation / bias fold as the kernel."""
    xw = jnp.concatenate([user_x @ params["wu"], movie_x @ params["wm"]], axis=-1)
    bcat = jnp.concatenate([params["bu"], params["bm"]], axis=-1)
    b1_eff = params["b1"] + bcat @ params["w1"]
    acc = jnp.dot(a_hat_bf16, xw.astype(jnp.bfloat16),
                  preferred_element_type=jnp.float32)
    h1 = jnp.maximum(
        jnp.dot(acc.astype(jnp.bfloat16), params["w1"].astype(jnp.bfloat16),
                preferred_element_type=jnp.float32) + b1_eff, 0.0)
    return jnp.dot(h1.astype(jnp.bfloat16), params["w2"].astype(jnp.bfloat16),
                   preferred_element_type=jnp.float32) + params["b2"]


if __name__ == "__main__":
    # Small synthetic heterogeneous-graph data (num_users == num_movies so the
    # torch.cat(dim=-1) in the reference module is well defined). N deliberately not a
    # multiple of the tile size to exercise the independent row/col padding.
    N = 300          # users == movies
    E = 600          # edges
    H = 64           # hidden_dim (module default)
    USER_F, MOVIE_F, MLP_H = 3, 18, 128

    key = jax.random.PRNGKey(0)
    ks = jax.random.split(key, 11)

    user_x = jax.random.normal(ks[0], (N, USER_F), jnp.float32)
    movie_x = jax.random.normal(ks[1], (N, MOVIE_F), jnp.float32)
    edge_index = jnp.stack([
        jax.random.randint(ks[2], (E,), 0, N),   # src (user idx)
        jax.random.randint(ks[3], (E,), 0, N),   # dst (movie idx)
    ]).astype(jnp.int32)
    edge_attr = jax.random.uniform(ks[4], (E,), jnp.float32, 0.1, 1.0)  # edge weights
    # TODO(synk): the PyTorch forward does `print(edge_attr)` — host side-effect only; omitted.

    scale = 0.1
    params = {
        # GCNConv weights stored transposed ([in, out]) so the wrapper uses x @ W
        "wu": scale * jax.random.normal(ks[5], (USER_F, H), jnp.float32),
        "bu": jnp.zeros((1, H), jnp.float32),
        "wm": scale * jax.random.normal(ks[6], (MOVIE_F, H), jnp.float32),
        "bm": jnp.zeros((1, H), jnp.float32),
        # MLP: Linear(2H, 128), Linear(128, 1)
        "w1": scale * jax.random.normal(ks[7], (2 * H, MLP_H), jnp.float32),
        "b1": scale * jax.random.normal(ks[8], (1, MLP_H), jnp.float32),
        "w2": scale * jax.random.normal(ks[9], (MLP_H, 1), jnp.float32),
        "b2": scale * jax.random.normal(ks[10], (1, 1), jnp.float32),
    }

    out = gnn_forward_pallas(user_x, movie_x, edge_index, edge_attr, params,
                             tm=512, tk=512)
    out = jax.block_until_ready(out)
    assert out.shape == (N, 1)

    # Tight check vs a reference using the same bf16 A / bf16 operands / bias fold.
    a_bf = gcn_norm_dense_padded(edge_index, edge_attr, N, N, N, dtype=jnp.bfloat16)
    ref_q = gnn_forward_ref_quant(a_bf, user_x, movie_x, params)
    assert jnp.allclose(out, ref_q, atol=2e-3, rtol=2e-3), \
        "Pallas output mismatch vs bf16-operand reference"

    # Loose check vs the full-f32 reference (bf16 operand quantization only).
    a_f32 = gcn_norm_dense_padded(edge_index, edge_attr, N, N, N, dtype=jnp.float32)
    ref_f32 = gnn_forward_ref(a_f32, user_x, movie_x, params)
    assert jnp.allclose(out, ref_f32, atol=5e-2, rtol=5e-2), \
        "Pallas output mismatch vs f32 reference"

    print("KERNEL_OK")
</pallas_src>

<mosaic_0001>
module attributes {stable_mosaic.version = 11 : i64} {
  func.func @_gnn_kernel(%arg0: i32, %arg1: i32, %arg2: memref<384x384xbf16, #tpu.memory_space<vmem>>, %arg3: memref<384x128xbf16, #tpu.memory_space<vmem>>, %arg4: memref<128x128xbf16, #tpu.memory_space<vmem>>, %arg5: memref<1x128xf32, #tpu.memory_space<vmem>>, %arg6: memref<128x128xbf16, #tpu.memory_space<vmem>>, %arg7: memref<1x128xf32, #tpu.memory_space<vmem>>, %arg8: memref<384x128xf32, #tpu.memory_space<vmem>>, %arg9: memref<384x128xf32, #tpu.memory_space<vmem>>) attributes {dimension_semantics = [#tpu.dimension_semantics<parallel>, #tpu.dimension_semantics<arbitrary>], iteration_bounds = array<i64: 1, 1>, scalar_prefetch = 0 : i64, scratch_operands = 1 : i64, tpu.core_type = #tpu.core_type<tc>, window_params = [{transform_indices = @transform_0, window_bounds = array<i64: 384, 384>}, {pipeline_mode = #tpu.pipeline_mode<synchronous>, transform_indices = @transform_1, window_bounds = array<i64: 384, 128>}, {pipeline_mode = #tpu.pipeline_mode<synchronous>, transform_indices = @transform_2, window_bounds = array<i64: 128, 128>}, {pipeline_mode = #tpu.pipeline_mode<synchronous>, transform_indices = @transform_3, window_bounds = array<i64: 1, 128>}, {pipeline_mode = #tpu.pipeline_mode<synchronous>, transform_indices = @transform_4, window_bounds = array<i64: 128, 128>}, {pipeline_mode = #tpu.pipeline_mode<synchronous>, transform_indices = @transform_5, window_bounds = array<i64: 1, 128>}, {transform_indices = @transform_6, window_bounds = array<i64: 384, 128>}]} {
    %c0_i32 = arith.constant 0 : i32
    %0 = arith.cmpi eq, %arg1, %c0_i32 : i32
    %1 = arith.extui %0 : i1 to i32
    %c0_i32_0 = arith.constant 0 : i32
    %2 = arith.cmpi ne, %1, %c0_i32_0 : i32
    scf.if %2 {
      %cst_9 = arith.constant 0.000000e+00 : f32
      %15 = vector.broadcast %cst_9 : f32 to vector<384x128xf32>
      %c0_10 = arith.constant 0 : index
      %c0_11 = arith.constant 0 : index
      %16 = vector.load %arg9[%c0_10, %c0_11] : memref<384x128xf32, #tpu.memory_space<vmem>>, vector<384x128xf32>
      tpu.vector_store %arg9[%c0_10, %c0_11], %15 {strides = array<i32>} : memref<384x128xf32, #tpu.memory_space<vmem>>, vector<384x128xf32>,
    } else {
    }
    %c384_i32 = arith.constant 384 : i32
    %3 = arith.muli %arg1, %c384_i32 : i32
    %4 = tpu.assume_multiple %3, 384 : i32
    %5 = arith.index_cast %4 : i32 to index
    %c0 = arith.constant 0 : index
    %6 = vector.load %arg3[%5, %c0] : memref<384x128xbf16, #tpu.memory_space<vmem>>, vector<384x128xbf16>
    %c0_1 = arith.constant 0 : index
    %c0_2 = arith.constant 0 : index
    %7 = vector.load %arg9[%c0_1, %c0_2] : memref<384x128xf32, #tpu.memory_space<vmem>>, vector<384x128xf32>
    %c0_3 = arith.constant 0 : index
    %c0_4 = arith.constant 0 : index
    %8 = vector.load %arg2[%c0_3, %c0_4] : memref<384x384xbf16, #tpu.memory_space<vmem>>, vector<384x384xbf16>
    %cst = arith.constant dense<0.000000e+00> : vector<384x128xf32>
    %9 = tpu.matmul %8, %6, %cst {dimension_numbers = #tpu.dot_dimension_numbers<[1], [0], [0], [1], [0, 0, 1, 1], [], []>} : vector<384x384xbf16>, vector<384x128xbf16>, vector<384x128xf32> -> vector<384x128xf32>
    %10 = arith.addf %7, %9 : vector<384x128xf32>
    %c0_5 = arith.constant 0 : index
    %c0_6 = arith.constant 0 : index
    %11 = vector.load %arg9[%c0_5, %c0_6] : memref<384x128xf32, #tpu.memory_space<vmem>>, vector<384x128xf32>
    tpu.vector_store %arg9[%c0_5, %c0_6], %10 {strides = array<i32>} : memref<384x128xf32, #tpu.memory_space<vmem>>, vector<384x128xf32>,
    %c0_i32_7 = arith.constant 0 : i32
    %12 = arith.cmpi eq, %arg1, %c0_i32_7 : i32
    %13 = arith.extui %12 : i1 to i32
    %c0_i32_8 = arith.constant 0 : i32
    %14 = arith.cmpi ne, %13, %c0_i32_8 : i32
    scf.if %14 {
      %c0_9 = arith.constant 0 : index
      %c0_10 = arith.constant 0 : index
      %15 = vector.load %arg9[%c0_9, %c0_10] : memref<384x128xf32, #tpu.memory_space<vmem>>, vector<384x128xf32>
      %16 = arith.truncf %15 : vector<384x128xf32> to vector<384x128xbf16>
      %c0_11 = arith.constant 0 : index
      %c0_12 = arith.constant 0 : index
      %17 = vector.load %arg4[%c0_11, %c0_12] : memref<128x128xbf16, #tpu.memory_space<vmem>>, vector<128x128xbf16>
      %cst_13 = arith.constant dense<0.000000e+00> : vector<384x128xf32>
      %18 = tpu.matmul %16, %17, %cst_13 {dimension_numbers = #tpu.dot_dimension_numbers<[1], [0], [0], [1], [0, 0, 1, 1], [], []>} : vector<384x128xbf16>, vector<128x128xbf16>, vector<384x128xf32> -> vector<384x128xf32>
      %c0_14 = arith.constant 0 : index
      %c0_15 = arith.constant 0 : index
      %19 = vector.load %arg5[%c0_14, %c0_15] : memref<1x128xf32, #tpu.memory_space<vmem>>, vector<1x128xf32>
      %20 = vector.broadcast %19 : vector<1x128xf32> to vector<384x128xf32>
      %21 = arith.addf %18, %20 : vector<384x128xf32>
      %cst_16 = arith.constant 0.000000e+00 : f32
      %22 = vector.broadcast %cst_16 : f32 to vector<384x128xf32>
      %23 = arith.maximumf %21, %22 : vector<384x128xf32>
      %24 = arith.truncf %23 : vector<384x128xf32> to vector<384x128xbf16>
      %c0_17 = arith.constant 0 : index
      %c0_18 = arith.constant 0 : index
      %25 = vector.load %arg6[%c0_17, %c0_18] : memref<128x128xbf16, #tpu.memory_space<vmem>>, vector<128x128xbf16>
      %cst_19 = arith.constant dense<0.000000e+00> : vector<384x128xf32>
      %26 = tpu.matmul %24, %25, %cst_19 {dimension_numbers = #tpu.dot_dimension_numbers<[1], [0], [0], [1], [0, 0, 1, 1], [], []>} : vector<384x128xbf16>, vector<128x128xbf16>, vector<384x128xf32> -> vector<384x128xf32>
      %c0_20 = arith.constant 0 : index
      %c0_21 = arith.constant 0 : index
      %27 = vector.load %arg7[%c0_20, %c0_21] : memref<1x128xf32, #tpu.memory_space<vmem>>, vector<1x128xf32>
      %28 = vector.broadcast %27 : vector<1x128xf32> to vector<384x128xf32>
      %29 = arith.addf %26, %28 : vector<384x128xf32>
      %c0_22 = arith.constant 0 : index
      %c0_23 = arith.constant 0 : index
      %30 = vector.load %arg8[%c0_22, %c0_23] : memref<384x128xf32, #tpu.memory_space<vmem>>, vector<384x128xf32>
      tpu.vector_store %arg8[%c0_22, %c0_23], %29 {strides = array<i32>} : memref<384x128xf32, #tpu.memory_space<vmem>>, vector<384x128xf32>,
    } else {
    }
    return
  }
  func.func @transform_0(%arg0: i32, %arg1: i32) -> (i32, i32) {
    %c0_i32 = arith.constant 0 : i32
    return %arg0, %arg1 : i32, i32
  }
  func.func @transform_1(%arg0: i32, %arg1: i32) -> (i32, i32) {
    %c0_i32 = arith.constant 0 : i32
    %c0_i32_0 = arith.constant 0 : i32
    %c0_i32_1 = arith.constant 0 : i32
    return %c0_i32, %c0_i32_0 : i32, i32
  }
  func.func @transform_2(%arg0: i32, %arg1: i32) -> (i32, i32) {
    %c0_i32 = arith.constant 0 : i32
    %c0_i32_0 = arith.constant 0 : i32
    %c0_i32_1 = arith.constant 0 : i32
    return %c0_i32, %c0_i32_0 : i32, i32
  }
  func.func @transform_3(%arg0: i32, %arg1: i32) -> (i32, i32) {
    %c0_i32 = arith.constant 0 : i32
    %c0_i32_0 = arith.constant 0 : i32
    %c0_i32_1 = arith.constant 0 : i32
    return %c0_i32, %c0_i32_0 : i32, i32
  }
  func.func @transform_4(%arg0: i32, %arg1: i32) -> (i32, i32) {
    %c0_i32 = arith.constant 0 : i32
    %c0_i32_0 = arith.constant 0 : i32
    %c0_i32_1 = arith.constant 0 : i32
    return %c0_i32, %c0_i32_0 : i32, i32
  }
  func.func @transform_5(%arg0: i32, %arg1: i32) -> (i32, i32) {
    %c0_i32 = arith.constant 0 : i32
    %c0_i32_0 = arith.constant 0 : i32
    %c0_i32_1 = arith.constant 0 : i32
    return %c0_i32, %c0_i32_0 : i32, i32
  }
  func.func @transform_6(%arg0: i32, %arg1: i32) -> (i32, i32) {
    %c0_i32 = arith.constant 0 : i32
    %c0_i32_0 = arith.constant 0 : i32
    return %arg0, %c0_i32 : i32, i32
  }
}

</mosaic_0001>

<bundles_post_ra>
// kernel: tpu_custom_call.1
= control target key start
LH: loop header
LB: loop body
LE: loop exit
PB: predicated region body
PF: predicated region fallthrough
CT: control target
= control target key end

     0   :  { %11 = vsyncpa [#allocation4], 0  ;;  %s2959_s0 = inlined_call_operand.hbm [shape: bf16[384,384], index: 0, kind: input, shape index: {}]   ;;  %s2960_s1 = inlined_call_operand.hbm [shape: bf16[384,128], index: 1, kind: input, shape index: {}]   ;;  %s2961_s2 = inlined_call_operand.hbm [shape: bf16[128,128], index: 2, kind: input, shape index: {}]   ;;  %s2962_s3 = inlined_call_operand.vmem [shape: f32[1,128], index: 3, kind: input, shape index: {}]   ;;  %s2963_s4 = inlined_call_operand.hbm [shape: bf16[128,128], index: 4, kind: input, shape index: {}]   ;;  %s2964_s5 = inlined_call_operand.vmem [shape: f32[1,128], index: 5, kind: input, shape index: {}]   ;;  %s2965_s6 = inlined_call_operand.hbm [shape: f32[384,128], index: 6, kind: output, shape index: {}]  }
   0x1   :  { %12 = vsyncpa [#allocation7], 0 }
   0x2   :  { %13 = vsyncpa [#allocation10], 0  ;;  %s32_s23 = sshll.u32 %s2960_s1, 4  ;;  %s33_s23 = int_to_ptr.hbm [resolvable:$true] %s32_s23 }
   0x3   :  { %14 = vsyncpa [#allocation5], 0  ;;  %s2684_s24 = smov [#allocation6]   ;;  %s19_s28 = sshll.u32 %s2959_s0, 4  ;;  %s20_s28 = int_to_ptr.hbm [resolvable:$true] %s19_s28 }
   0x4   :  { %s34_s25 = sshll.u32 %s2684_s24, 4  ;;  %s2685_s29 = smov 64   ;;  %s35_s25 = int_to_ptr.vmem [resolvable:$true] %s34_s25 }
   0x5   :  { %s2686_s30 = smov 4   ;;  %s2687_s7 = smov [#allocation3]  }
   0x6   :  { %40 = dma.hbm_to_vmem [thread:$0]  %s33_s23, 3072, %s35_s25, [#allocation7], %s2685_s29, %s2685_s29, %s2686_s30  }
   0x7   :  { %s21_s8 = sshll.u32 %s2687_s7, 4  ;;  %s2688_s9 = smov 192   ;;  %s22_s8 = int_to_ptr.vmem [resolvable:$true] %s21_s8 }
   0x8   :  { %s2689_s10 = smov 12   ;;  %s45_s12 = sshll.u32 %s2961_s2, 4  ;;  %s46_s12 = int_to_ptr.hbm [resolvable:$true] %s45_s12 }
   0x9   :  { %27 = dma.hbm_to_vmem [thread:$0]  %s20_s28, 9216, %s22_s8, [#allocation4], %s2688_s9, %s2688_s9, %s2689_s10  }
   0xa   :  { %s2690_s13 = smov [#allocation8]   ;;  %s60_s16 = sshll.u32 %s2963_s4, 4  ;;  %s61_s16 = int_to_ptr.hbm [resolvable:$true] %s60_s16 }
   0xb   :  { %s47_s14 = sshll.u32 %s2690_s13, 4  ;;  %s2691_s17 = smov [#allocation9]   ;;  %s48_s14 = int_to_ptr.vmem [resolvable:$true] %s47_s14 }
   0xc   :  { %53 = dma.hbm_to_vmem [thread:$0]  %s46_s12, 1024, %s48_s14, [#allocation7], %s2685_s29, %s2685_s29, %s2686_s30  }
   0xd   :  { %s62_s18 = sshll.u32 %s2691_s17, 4  ;;  %s63_s18 = int_to_ptr.vmem [resolvable:$true] %s62_s18 }
   0xe   :  { %68 = dma.hbm_to_vmem [thread:$0]  %s61_s16, 1024, %s63_s18, [#allocation10], %s2685_s29, %s2685_s29, %s2686_s30  }
   0xf   :  { %2676 = dma.done.wait [#allocation4], 9216  }
  0x10   :  { %2677 = vsyncadd [#allocation4], 4294958080 }
  0x11   :  { %2678 = dma.done.wait [#allocation7], 4096  }
  0x12   :  { %2679 = vsyncadd [#allocation7], 4294963200 }
  0x13   :  { %2680 = dma.done.wait [#allocation10], 1024  }
  0x14   :  { %2681 = vsyncadd [#allocation10], 4294966272  ;;  %v2414_v0 = vld [vmem:[#allocation6 + $0x38] sm:$0xff]  ;;  %v2413_v1 = vld [vmem:[#allocation6 + $0x30] sm:$0xff]  ;;  %s1942_s23 = sshll.u32 %s2965_s6, 4  ;;  %s2693_s24 = smov 128   ;;  %s1943_s23 = int_to_ptr.hbm [resolvable:$true] %s1942_s23 }
  0x15   :  { %2519 = vmatpush.bf16.msra.mxu1 %v2414_v0  ;;  %2520 = vmatpush.bf16.msra.mxu2 %v2414_v0  ;;  %v2412_v2 = vld [vmem:[#allocation6 + $0x28] sm:$0xff]  ;;  %v2411_v3 = vld [vmem:[#allocation6 + $0x20] sm:$0xff]  ;;  %v2410_v4 = vld [vmem:[#allocation6 + $0x18] sm:$0xff]  ;;  %s2694_s25 = smov 8  }
  0x16   :  { %864 = vmatpush.bf16.msra.mxu0 %v2414_v0  ;;  %2521 = vmatpush.bf16.msra.mxu3 %v2414_v0  ;;  %v2409_v5 = vld [vmem:[#allocation6 + $0x10] sm:$0xff]  ;;  %v2408_v6 = vld [vmem:[#allocation6 + $0x8] sm:$0xff]  ;;  %v2407_v7 = vld [vmem:[#allocation6] sm:$0xff] }
  0x17   :  { %v2033_v8 = vld [vmem:[#allocation3 + $0x90] sm:$0xf]  ;;  %v2450_v9 = vld [vmem:[#allocation3 + $0x98] sm:$0xf0]  ;;  %v2105_v10 = vld [vmem:[#allocation3 + $0x120] sm:$0xf] }
  0x18   :  { %v2468_v11 = vld [vmem:[#allocation3 + $0x128] sm:$0xf0]  ;;  %v2430_v12 = vld [vmem:[#allocation6 + $0xb8] sm:$0xff]  ;;  %v2034_v14 = vor.u32 %v2450_v9, %v2033_v8  ;;  %v2429_v16 = vld [vmem:[#allocation6 + $0xb0] sm:$0xff] }
  0x19   :  { %2522 = vmatpush.bf16.msra.mxu1 %v2413_v1  ;;  %2523 = vmatpush.bf16.msra.mxu2 %v2413_v1  ;;  %v2422_v13 = vld [vmem:[#allocation6 + $0x78] sm:$0xff]  ;;  %v2106_v15 = vor.u32 %v2468_v11, %v2105_v10  ;;  %v2421_v17 = vld [vmem:[#allocation6 + $0x70] sm:$0xff]  ;;  %v2428_v18 = vld [vmem:[#allocation6 + $0xa8] sm:$0xff] }
  0x1a   :  { %865 = vmatpush.bf16.msra.mxu0 %v2413_v1  ;;  %2524 = vmatpush.bf16.msra.mxu3 %v2413_v1  ;;  %v2420_v19 = vld [vmem:[#allocation6 + $0x68] sm:$0xff]  ;;  %v2427_v20 = vld [vmem:[#allocation6 + $0xa0] sm:$0xff]  ;;  %v2453_v23 = vld [vmem:[#allocation3 + $0xb0] sm:$0xf0] }
  0x1b   :  { %v2419_v21 = vld [vmem:[#allocation6 + $0x60] sm:$0xff]  ;;  %v2045_v22 = vld [vmem:[#allocation3 + $0xa8] sm:$0xf]  ;;  %v2117_v24 = vld [vmem:[#allocation3 + $0x138] sm:$0xf] }
  0x1c   :  { %v2471_v25 = vld [vmem:[#allocation3 + $0x140] sm:$0xf0]  ;;  %v2046_v26 = vor.u32 %v2453_v23, %v2045_v22  ;;  %v2426_v28 = vld [vmem:[#allocation6 + $0x98] sm:$0xff]  ;;  %v2425_v30 = vld [vmem:[#allocation6 + $0x90] sm:$0xff] }
  0x1d   :  { %2525 = vmatpush.bf16.msra.mxu1 %v2412_v2  ;;  %2526 = vmatpush.bf16.msra.mxu2 %v2412_v2  ;;  %v2118_v27 = vor.u32 %v2471_v25, %v2117_v24  ;;  %v2418_v29 = vld [vmem:[#allocation6 + $0x58] sm:$0xff]  ;;  %v2057_v31 = vld [vmem:[#allocation3 + $0xc0] sm:$0xf]  ;;  %v2456_v32 = vld [vmem:[#allocation3 + $0xc8] sm:$0xf0] }
  0x1e   :  { %866 = vmatpush.bf16.msra.mxu0 %v2412_v2  ;;  %2527 = vmatpush.bf16.msra.mxu3 %v2412_v2  ;;  %v2129_v33 = vld [vmem:[#allocation3 + $0x150] sm:$0xf]  ;;  %v2474_v34 = vld [vmem:[#allocation3 + $0x158] sm:$0xf0]  ;;  %v2058_v35 = vor.u32 %v2456_v32, %v2057_v31  ;;  %v2424_v38 = vld [vmem:[#allocation6 + $0x88] sm:$0xff] }
  0x1f   :  { %v2130_v36 = vor.u32 %v2474_v34, %v2129_v33  ;;  %v2417_v37 = vld [vmem:[#allocation6 + $0x50] sm:$0xff]  ;;  %v2416_v39 = vld [vmem:[#allocation6 + $0x48] sm:$0xff]  ;;  %v2069_v40 = vld [vmem:[#allocation3 + $0xd8] sm:$0xf] }
  0x20   :  { %v2459_v41 = vld [vmem:[#allocation3 + $0xe0] sm:$0xf0]  ;;  %v2141_v42 = vld [vmem:[#allocation3 + $0x168] sm:$0xf]  ;;  %v2477_v43 = vld [vmem:[#allocation3 + $0x170] sm:$0xf0] }
  0x21   :  { %2528 = vmatpush.bf16.msra.mxu1 %v2411_v3  ;;  %2529 = vmatpush.bf16.msra.mxu2 %v2411_v3  ;;  %v2070_v44 = vor.u32 %v2459_v41, %v2069_v40  ;;  %v2142_v45 = vor.u32 %v2477_v43, %v2141_v42  ;;  %v2423_v46 = vld [vmem:[#allocation6 + $0x80] sm:$0xff]  ;;  %v2432_v49 = vld [vmem:[#allocation3 + $0x8] sm:$0xf0]  ;;  %v2081_v51 = vld [vmem:[#allocation3 + $0xf0] sm:$0xf] }
  0x22   :  { %867 = vmatpush.bf16.msra.mxu0 %v2411_v3  ;;  %2530 = vmatpush.bf16.msra.mxu3 %v2411_v3  ;;  %v2415_v47 = vld [vmem:[#allocation6 + $0x40] sm:$0xff]  ;;  %v2462_v52 = vld [vmem:[#allocation3 + $0xf8] sm:$0xf0]  ;;  %v2480_v54 = vld [vmem:[#allocation3 + $0x188] sm:$0xf0] }
  0x23   :  { %v1961_v48 = vld [vmem:[#allocation3] sm:$0xf]  ;;  %v2082_v55 = vor.u32 %v2462_v52, %v2081_v51  ;;  %v1973_v57 = vld [vmem:[#allocation3 + $0x18] sm:$0xf]  ;;  %v2435_v58 = vld [vmem:[#allocation3 + $0x20] sm:$0xf0] }
  0x24   :  { %v1962_v50 = vor.u32 %v2432_v49, %v1961_v48  ;;  %v2153_v53 = vld [vmem:[#allocation3 + $0x180] sm:$0xf]  ;;  %v1974_v59 = vor.u32 %v2435_v58, %v1973_v57  ;;  %v2093_v60 = vld [vmem:[#allocation3 + $0x108] sm:$0xf]  ;;  %v2465_v61 = vld [vmem:[#allocation3 + $0x110] sm:$0xf0] }
  0x25   :  { %2531 = vmatpush.bf16.msra.mxu1 %v2410_v4  ;;  %2532 = vmatpush.bf16.msra.mxu2 %v2410_v4  ;;  %v2154_v56 = vor.u32 %v2480_v54, %v2153_v53  ;;  %v2165_v62 = vld [vmem:[#allocation3 + $0x198] sm:$0xf]  ;;  %v2483_v63 = vld [vmem:[#allocation3 + $0x1a0] sm:$0xf0]  ;;  %v2094_v0 = vor.u32 %v2465_v61, %v2093_v60  ;;  %v1985_v2 = vld [vmem:[#allocation3 + $0x30] sm:$0xf] }
  0x26   :  { %868 = vmatpush.bf16.msra.mxu0 %v2410_v4  ;;  %2533 = vmatpush.bf16.msra.mxu3 %v2410_v4  ;;  %v2166_v1 = vor.u32 %v2483_v63, %v2165_v62  ;;  %v2438_v3 = vld [vmem:[#allocation3 + $0x38] sm:$0xf0]  ;;  %v2433_v8 = vld [vmem:[#allocation3 + $0x10] sm:$0xf0]  ;;  %v2177_v11 = vld [vmem:[#allocation3 + $0x1b0] sm:$0xf] }
  0x27   :  { %v1986_v4 = vor.u32 %v2438_v3, %v1985_v2  ;;  %v2510_v23 = vld [vmem:[#allocation8 + $0x38] sm:$0xff]  ;;  %v2189_v24 = vld [vmem:[#allocation3 + $0x1c8] sm:$0xf]  ;;  %v2489_v25 = vld [vmem:[#allocation3 + $0x1d0] sm:$0xf0] }
  0x28   :  { %v2009_v31 = vld [vmem:[#allocation3 + $0x60] sm:$0xf]  ;;  %v2444_v32 = vld [vmem:[#allocation3 + $0x68] sm:$0xf0]  ;;  %v2509_v34 = vld [vmem:[#allocation8 + $0x30] sm:$0xff] }
  0x29   :  { %2534 = vmatpush.bf16.msra.mxu1 %v2409_v5  ;;  %2535 = vmatpush.bf16.msra.mxu2 %v2409_v5  ;;  %v2010_v33 = vor.u32 %v2444_v32, %v2009_v31  ;;  %v2201_v40 = vld [vmem:[#allocation3 + $0x1e0] sm:$0xf]  ;;  %v2492_v41 = vld [vmem:[#allocation3 + $0x1e8] sm:$0xf0]  ;;  %v2021_v48 = vld [vmem:[#allocation3 + $0x78] sm:$0xf] }
  0x2a   :  { %869 = vmatpush.bf16.msra.mxu0 %v2409_v5  ;;  %2536 = vmatpush.bf16.msra.mxu3 %v2409_v5  ;;  %v2431_v5 = vld [vmem:[#allocation3 + $0x4] sm:$0xf]  ;;  %v2508_v42 = vld [vmem:[#allocation8 + $0x28] sm:$0xff]  ;;  %v2202_v43 = vor.u32 %v2492_v41, %v2201_v40  ;;  %v2213_v58 = vld [vmem:[#allocation3 + $0x1f8] sm:$0xf] }
  0x2b   :  { %v2447_v49 = vld [vmem:[#allocation3 + $0x80] sm:$0xf0]  ;;  %v2011_v62 = vld [vmem:[#allocation3 + $0x6c] sm:$0xf0]  ;;  %v2017_v63 = vld [vmem:[#allocation3 + $0x68] sm:$0xf] }
  0x2c   :  { %v2443_v61 = vld [vmem:[#allocation3 + $0x64] sm:$0xf]  ;;  %v2452_v40 = vld [vmem:[#allocation3 + $0xac] sm:$0xf]  ;;  %v2047_v41 = vld [vmem:[#allocation3 + $0xb4] sm:$0xf0] }
  0x2d   :  { %2537 = vmatpush.bf16.msra.mxu1 %v2408_v6  ;;  %2538 = vmatpush.bf16.msra.mxu2 %v2408_v6  ;;  %v2014_v2 = vor.u32 %v2443_v61, %v2011_v62 }
  0x2e   :  { %870 = vmatpush.bf16.msra.mxu0 %v2408_v6  ;;  %2539 = vmatpush.bf16.msra.mxu3 %v2408_v6  ;;  %v1963_v6 = vld [vmem:[#allocation3 + $0xc] sm:$0xf0] }
  0x2f   :  { %v1966_v9 = vor.u32 %v2431_v5, %v1963_v6  ;;  %v2506_v5 = vld [vmem:[#allocation8 + $0x18] sm:$0xff] }
  0x31   :  { %2540 = vmatpush.bf16.msra.mxu1 %v2407_v7  ;;  %2541 = vmatpush.bf16.msra.mxu2 %v2407_v7 }
  0x32   :  { %871 = vmatpush.bf16.msra.mxu0 %v2407_v7  ;;  %2542 = vmatpush.bf16.msra.mxu3 %v2407_v7  ;;  %v1969_v7 = vld [vmem:[#allocation3 + $0x8] sm:$0xf] }
  0x33   :  { %v1970_v10 = vor.u32 %v2433_v8, %v1969_v7  ;;  %v2225_v8 = vld [vmem:[#allocation3 + $0x210] sm:$0xf] }
  0x34   :  { %902 = vmatmul.bf16.vlgmr.msra.gmra.mxu1 %v2034_v14  ;;  %932 = vmatmul.bf16.vlgmr.msra.gmra.mxu2 %v2106_v15  ;;  %v2434_v14 = vld [vmem:[#allocation3 + $0x1c] sm:$0xf]  ;;  %v1975_v15 = vld [vmem:[#allocation3 + $0x24] sm:$0xf0] }
  0x35   :  { %1122 = vmatpush.bf16.msrb.mxu2 %v2430_v12  ;;  %993 = vmatpush.bf16.msrb.mxu1 %v2422_v13  ;;  %v2486_v12 = vld [vmem:[#allocation3 + $0x1b8] sm:$0xf0] }
  0x36   :  { %872 = vmatmul.bf16.vlgmr.msra.gmra.mxu0 %v1962_v50  ;;  %v2178_v13 = vor.u32 %v2486_v12, %v2177_v11  ;;  %1490 = vmatpush.bf16.msrb.mxu3 %v2510_v23  ;;  %v2022_v50 = vor.u32 %v2447_v49, %v2021_v48  ;;  %v2446_v11 = vld [vmem:[#allocation3 + $0x7c] sm:$0xf]  ;;  %v2023_v12 = vld [vmem:[#allocation3 + $0x84] sm:$0xf0]  ;;  %v2501_v23 = vld [vmem:[#allocation3 + $0x230] sm:$0xf0] }
  0x38   :  { %962 = vmatmul.bf16.vlgmr.msra.gmra.mxu3 %v2178_v13  ;;  %v2029_v13 = vld [vmem:[#allocation3 + $0x80] sm:$0xf] }
  0x39   :  { %1123 = vmatpush.bf16.msrb.mxu2 %v2429_v16  ;;  %994 = vmatpush.bf16.msrb.mxu1 %v2421_v17  ;;  %v1981_v16 = vld [vmem:[#allocation3 + $0x20] sm:$0xf]  ;;  %v2436_v17 = vld [vmem:[#allocation3 + $0x28] sm:$0xf0] }
  0x3a   :  { %v1982_v22 = vor.u32 %v2436_v17, %v1981_v16  ;;  %1491 = vmatpush.bf16.msrb.mxu3 %v2509_v34  ;;  %v2505_v16 = vld [vmem:[#allocation8 + $0x10] sm:$0xff]  ;;  %v2026_v17 = vor.u32 %v2446_v11, %v2023_v12  ;;  %v2460_v11 = vld [vmem:[#allocation3 + $0xe8] sm:$0xf0] }
  0x3d   :  { %1124 = vmatpush.bf16.msrb.mxu2 %v2428_v18  ;;  %995 = vmatpush.bf16.msrb.mxu1 %v2420_v19  ;;  %v1997_v18 = vld [vmem:[#allocation3 + $0x48] sm:$0xf]  ;;  %v2441_v19 = vld [vmem:[#allocation3 + $0x50] sm:$0xf0] }
  0x3e   :  { %1492 = vmatpush.bf16.msrb.mxu3 %v2508_v42  ;;  %v2053_v42 = vld [vmem:[#allocation3 + $0xb0] sm:$0xf] }
  0x41   :  { %1125 = vmatpush.bf16.msrb.mxu2 %v2427_v20  ;;  %996 = vmatpush.bf16.msrb.mxu1 %v2419_v21  ;;  %v1998_v20 = vor.u32 %v2441_v19, %v1997_v18  ;;  %v1978_v21 = vor.u32 %v2434_v14, %v1975_v15  ;;  %v2448_v14 = vld [vmem:[#allocation3 + $0x88] sm:$0xf0] }
  0x42   :  { %v2030_v18 = vor.u32 %v2448_v14, %v2029_v13 }
  0x44   :  { %907 = vmatmul.bf16.gmra.mxu1 %v2046_v26  ;;  %937 = vmatmul.bf16.gmra.mxu2 %v2118_v27  ;;  %v2190_v26 = vor.u32 %v2489_v25, %v2189_v24  ;;  %v2437_v27 = vld [vmem:[#allocation3 + $0x34] sm:$0xf]  ;;  %v2504_v24 = vld [vmem:[#allocation8 + $0x8] sm:$0xff] }
  0x45   :  { %1126 = vmatpush.bf16.msrb.mxu2 %v2426_v28  ;;  %997 = vmatpush.bf16.msrb.mxu1 %v2418_v29  ;;  %v1987_v28 = vld [vmem:[#allocation3 + $0x3c] sm:$0xf0]  ;;  %v1993_v29 = vld [vmem:[#allocation3 + $0x38] sm:$0xf] }
  0x46   :  { %877 = vmatmul.bf16.gmra.mxu0 %v1974_v59  ;;  %v2495_v59 = vld [vmem:[#allocation3 + $0x200] sm:$0xf0] }
  0x47   :  { %v2214_v60 = vor.u32 %v2495_v59, %v2213_v58  ;;  %v2065_v58 = vld [vmem:[#allocation3 + $0xc8] sm:$0xf]  ;;  %v2457_v59 = vld [vmem:[#allocation3 + $0xd0] sm:$0xf0] }
  0x48   :  { %967 = vmatmul.bf16.gmra.mxu3 %v2190_v26  ;;  %v2449_v26 = vld [vmem:[#allocation3 + $0x94] sm:$0xf]  ;;  %v2066_v62 = vor.u32 %v2457_v59, %v2065_v58  ;;  %v2518_v58 = vld [vmem:[#allocation9 + $0x38] sm:$0xff] }
  0x49   :  { %1127 = vmatpush.bf16.msrb.mxu2 %v2425_v30  ;;  %998 = vmatpush.bf16.msrb.mxu1 %v2417_v37  ;;  %v2439_v30 = vld [vmem:[#allocation3 + $0x40] sm:$0xf0] }
  0x4a   :  { %1759 = vmatpush.bf16.msrb.mxu0 %v2518_v58 }
  0x4d   :  { %1128 = vmatpush.bf16.msrb.mxu2 %v2424_v38  ;;  %999 = vmatpush.bf16.msrb.mxu1 %v2416_v39 }
  0x51   :  { %1129 = vmatpush.bf16.msrb.mxu2 %v2423_v46  ;;  %1000 = vmatpush.bf16.msrb.mxu1 %v2415_v47  ;;  %v2005_v46 = vld [vmem:[#allocation3 + $0x50] sm:$0xf]  ;;  %v2442_v47 = vld [vmem:[#allocation3 + $0x58] sm:$0xf0] }
  0x52   :  { %v2006_v53 = vor.u32 %v2442_v47, %v2005_v46  ;;  %v2050_v46 = vor.u32 %v2452_v40, %v2047_v41 }
  0x54   :  { %912 = vmatmul.bf16.gmra.mxu1 %v2058_v35  ;;  %942 = vmatmul.bf16.gmra.mxu2 %v2130_v36  ;;  %v1990_v35 = vor.u32 %v2437_v27, %v1987_v28  ;;  %v1994_v36 = vor.u32 %v2439_v30, %v1993_v29  ;;  %v2035_v27 = vld [vmem:[#allocation3 + $0x9c] sm:$0xf0]  ;;  %v2041_v28 = vld [vmem:[#allocation3 + $0x98] sm:$0xf]  ;;  %v2451_v29 = vld [vmem:[#allocation3 + $0xa0] sm:$0xf0] }
  0x55   :  { %v2038_v31 = vor.u32 %v2449_v26, %v2035_v27  ;;  %v2042_v32 = vor.u32 %v2451_v29, %v2041_v28  ;;  %v2461_v29 = vld [vmem:[#allocation3 + $0xf4] sm:$0xf] }
  0x56   :  { %882 = vmatmul.bf16.gmra.mxu0 %v1986_v4 }
  0x58   :  { %972 = vmatmul.bf16.gmra.mxu3 %v2202_v43  ;;  %v2454_v43 = vld [vmem:[#allocation3 + $0xb8] sm:$0xf0] }
  0x59   :  { %v2054_v47 = vor.u32 %v2454_v43, %v2053_v42 }
  0x64   :  { %917 = vmatmul.bf16.gmra.mxu1 %v2070_v44  ;;  %947 = vmatmul.bf16.gmra.mxu2 %v2142_v45  ;;  %v2440_v44 = vld [vmem:[#allocation3 + $0x4c] sm:$0xf]  ;;  %v1999_v45 = vld [vmem:[#allocation3 + $0x54] sm:$0xf0] }
  0x65   :  { %v2002_v52 = vor.u32 %v2440_v44, %v1999_v45 }
  0x66   :  { %887 = vmatmul.bf16.gmra.mxu0 %v1998_v20 }
  0x68   :  { %977 = vmatmul.bf16.gmra.mxu3 %v2214_v60 }
  0x74   :  { %922 = vmatmul.bf16.gmra.mxu1 %v2082_v55  ;;  %952 = vmatmul.bf16.gmra.mxu2 %v2154_v56  ;;  %v2507_v56 = vld [vmem:[#allocation8 + $0x20] sm:$0xff] }
  0x75   :  { %1493 = vmatpush.bf16.msrb.mxu3 %v2507_v56  ;;  %v2059_v56 = vld [vmem:[#allocation3 + $0xcc] sm:$0xf0] }
  0x76   :  { %892 = vmatmul.bf16.gmra.mxu0 %v2010_v33 }
  0x79   :  { %1494 = vmatpush.bf16.msrb.mxu3 %v2506_v5 }
  0x7d   :  { %1495 = vmatpush.bf16.msrb.mxu3 %v2505_v16 }
  0x81   :  { %1496 = vmatpush.bf16.msrb.mxu3 %v2504_v24 }
  0x84   :  { %927 = vmatmul.bf16.gmra.mxu1 %v2094_v0  ;;  %957 = vmatmul.bf16.gmra.mxu2 %v2166_v1  ;;  %v2445_v0 = vld [vmem:[#allocation3 + $0x70] sm:$0xf0] }
  0x85   :  { %v2018_v3 = vor.u32 %v2445_v0, %v2017_v63 }
  0x86   :  { %897 = vmatmul.bf16.gmra.mxu0 %v2022_v50 }
  0x94   :  { %1001 = vmatmul.bf16.vlgmr.msrb.gmra.mxu1 %v1966_v9  ;;  %1130 = vmatmul.bf16.vlgmr.msrb.gmra.mxu2 %v1970_v10  ;;  %v2498_v9 = vld [vmem:[#allocation3 + $0x218] sm:$0xf0] }
  0x95   :  { %v2226_v10 = vor.u32 %v2498_v9, %v2225_v8  ;;  %v2458_v8 = vld [vmem:[#allocation3 + $0xdc] sm:$0xf]  ;;  %v2071_v9 = vld [vmem:[#allocation3 + $0xe4] sm:$0xf0] }
  0x97   :  { %982 = vmatmul.bf16.gmra.mxu3 %v2226_v10  ;;  %v2077_v10 = vld [vmem:[#allocation3 + $0xe0] sm:$0xf] }
  0xa4   :  { %1006 = vmatmul.bf16.gmra.mxu1 %v1978_v21  ;;  %1135 = vmatmul.bf16.gmra.mxu2 %v1982_v22  ;;  %v2237_v22 = vld [vmem:[#allocation3 + $0x228] sm:$0xf] }
  0xa5   :  { %v2238_v25 = vor.u32 %v2501_v23, %v2237_v22  ;;  %v2078_v22 = vor.u32 %v2460_v11, %v2077_v10 }
  0xa7   :  { %987 = vmatmul.bf16.gmra.mxu3 %v2238_v25 }
  0xb1   :  { %v2742_v37 = vpop.f32.mrf.mxu1 }
  0xb3   :  { %v873_v45 = vpop.f32.mrf.mxu0 }
  0xb4   :  { %1011 = vmatmul.bf16.gmra.mxu1 %v1990_v35  ;;  %1140 = vmatmul.bf16.gmra.mxu2 %v1994_v36  ;;  %v2503_v35 = vld [vmem:[#allocation8] sm:$0xff] }
  0xb5   :  { %1497 = vmatpush.bf16.msrb.mxu3 %v2503_v35  ;;  %v2463_v35 = vld [vmem:[#allocation3 + $0x100] sm:$0xf0] }
  0xb7   :  { %v2744_v38 = vpop.f32.mrf.mxu2 }
  0xb9   :  { %v2746_v39 = vpop.f32.mrf.mxu1 }
  0xbf   :  { %v2748_v51 = vpop.f32.mrf.mxu2 }
  0xc1   :  { %v2750_v54 = vpop.f32.mrf.mxu1 }
  0xc4   :  { %1016 = vmatmul.bf16.gmra.mxu1 %v2002_v52  ;;  %1145 = vmatmul.bf16.gmra.mxu2 %v2006_v53  ;;  %v875_v52 = vpop.f32.mrf.mxu0  ;;  %v2455_v53 = vld [vmem:[#allocation3 + $0xc4] sm:$0xf] }
  0xc5   :  { %v2062_v61 = vor.u32 %v2455_v53, %v2059_v56  ;;  %v2790_v56 = vpop.f32.mrf.mxu3 }
  0xc7   :  { %v2752_v55 = vpop.f32.mrf.mxu2 }
  0xc9   :  { %v2754_v57 = vpop.f32.mrf.mxu1 }
  0xcc   :  { %v878_v0 = vpop.f32.mrf.mxu0 }
  0xcf   :  { %v2756_v1 = vpop.f32.mrf.mxu2 }
  0xd1   :  { %v2758_v4 = vpop.f32.mrf.mxu1 }
  0xd4   :  { %1021 = vmatmul.bf16.gmra.mxu1 %v2014_v2  ;;  %1150 = vmatmul.bf16.gmra.mxu2 %v2018_v3  ;;  %v880_v12 = vpop.f32.mrf.mxu0 }
  0xd7   :  { %v2760_v6 = vpop.f32.mrf.mxu2 }
  0xd9   :  { %v2762_v7 = vpop.f32.mrf.mxu1 }
  0xdc   :  { %v883_v26 = vpop.f32.mrf.mxu0 }
  0xdf   :  { %v2764_v15 = vpop.f32.mrf.mxu2 }
  0xe1   :  { %v2766_v19 = vpop.f32.mrf.mxu1 }
  0xe4   :  { %1026 = vmatmul.bf16.gmra.mxu1 %v2026_v17  ;;  %1155 = vmatmul.bf16.gmra.mxu2 %v2030_v18  ;;  %v2074_v18 = vor.u32 %v2458_v8, %v2071_v9  ;;  %v2466_v8 = vld [vmem:[#allocation3 + $0x118] sm:$0xf0] }
  0xe7   :  { %v2768_v20 = vpop.f32.mrf.mxu2 }
  0xe9   :  { %v2770_v21 = vpop.f32.mrf.mxu1 }
  0xef   :  { %v2772_v30 = vpop.f32.mrf.mxu2 }
  0xf1   :  { %v2774_v33 = vpop.f32.mrf.mxu1 }
  0xf4   :  { %1031 = vmatmul.bf16.gmra.mxu1 %v2038_v31  ;;  %1160 = vmatmul.bf16.gmra.mxu2 %v2042_v32  ;;  %v2083_v31 = vld [vmem:[#allocation3 + $0xfc] sm:$0xf0]  ;;  %v2089_v32 = vld [vmem:[#allocation3 + $0xf8] sm:$0xf] }
  0xf7   :  { %v2776_v34 = vpop.f32.mrf.mxu2 }
  0xf9   :  { %v2778_v36 = vpop.f32.mrf.mxu1 }
  0xff   :  { %v2780_v44 = vpop.f32.mrf.mxu2 }
 0x101   :  { %v2782_v48 = vpop.f32.mrf.mxu1 }
 0x104   :  { %1036 = vmatmul.bf16.gmra.mxu1 %v2050_v46  ;;  %1165 = vmatmul.bf16.gmra.mxu2 %v2054_v47  ;;  %v2090_v46 = vor.u32 %v2463_v35, %v2089_v32  ;;  %v2469_v32 = vld [vmem:[#allocation3 + $0x130] sm:$0xf0] }
 0x107   :  { %v2784_v49 = vpop.f32.mrf.mxu2 }
 0x109   :  { %v2786_v50 = vpop.f32.mrf.mxu1 }
 0x10f   :  { %v2788_v60 = vpop.f32.mrf.mxu2 }
 0x111   :  { %v1002_v63 = vpop.f32.mrf.mxu1 }
 0x112   :  { %v1003_v5 = vadd.f32 %v1002_v63, %v873_v45  ;;  %v2086_v45 = vor.u32 %v2461_v29, %v2083_v31  ;;  %v2107_v29 = vld [vmem:[#allocation3 + $0x12c] sm:$0xf0]  ;;  %v2113_v31 = vld [vmem:[#allocation3 + $0x128] sm:$0xf] }
 0x114   :  { %1041 = vmatmul.bf16.gmra.mxu1 %v2062_v61  ;;  %1170 = vmatmul.bf16.gmra.mxu2 %v2066_v62 }
 0x117   :  { %v1131_v2 = vpop.f32.mrf.mxu2 }
 0x118   :  { %v1132_v16 = vadd.f32 %v1131_v2, %v1003_v5  ;;  %v2792_v2 = vpop.f32.mrf.mxu3  ;;  %v2101_v5 = vld [vmem:[#allocation3 + $0x110] sm:$0xf] }
 0x119   :  { %v1004_v3 = vpop.f32.mrf.mxu1 }
 0x11a   :  { %v1005_v13 = vadd.f32 %v1004_v3, %v875_v52  ;;  %v885_v52 = vpop.f32.mrf.mxu0  ;;  %v2095_v3 = vld [vmem:[#allocation3 + $0x114] sm:$0xf0] }
 0x11f   :  { %v1133_v14 = vpop.f32.mrf.mxu2 }
 0x120   :  { %v1134_v17 = vadd.f32 %v1133_v14, %v1005_v13  ;;  %v2102_v14 = vor.u32 %v2466_v8, %v2101_v5  ;;  %v2119_v5 = vld [vmem:[#allocation3 + $0x144] sm:$0xf0]  ;;  %v2125_v8 = vld [vmem:[#allocation3 + $0x140] sm:$0xf] }
 0x121   :  { %v1007_v23 = vpop.f32.mrf.mxu1 }
 0x122   :  { %v1398_v24 = vpack.c.bf16 %v1134_v17, %v1132_v16  ;;  %v1008_v28 = vadd.f32 %v1007_v23, %v878_v0  ;;  %v888_v62 = vpop.f32.mrf.mxu0  ;;  %v2464_v0 = vld [vmem:[#allocation3 + $0x10c] sm:$0xf]  ;;  %v2794_v23 = vpop.f32.mrf.mxu3 }
 0x123   :  { %v2098_v13 = vor.u32 %v2464_v0, %v2095_v3  ;;  %v2470_v3 = vld [vmem:[#allocation3 + $0x13c] sm:$0xf] }
 0x124   :  { %1046 = vmatmul.bf16.gmra.mxu1 %v2074_v18  ;;  %1175 = vmatmul.bf16.gmra.mxu2 %v2078_v22  ;;  %v2517_v18 = vld [vmem:[#allocation9 + $0x30] sm:$0xff] }
 0x125   :  { %1498 = vmatmul.bf16.vlgmr.msrb.gmra.mxu3 %v1398_v24  ;;  %1760 = vmatpush.bf16.msrb.mxu0 %v2517_v18 }
 0x127   :  { %v1136_v25 = vpop.f32.mrf.mxu2 }
 0x128   :  { %v1137_v42 = vadd.f32 %v1136_v25, %v1008_v28  ;;  %v2467_v28 = vld [vmem:[#allocation3 + $0x124] sm:$0xf] }
 0x129   :  { %v1009_v27 = vpop.f32.mrf.mxu1 }
 0x12a   :  { %v1010_v40 = vadd.f32 %v1009_v27, %v880_v12  ;;  %v890_v22 = vpop.f32.mrf.mxu0 }
 0x12f   :  { %v1138_v41 = vpop.f32.mrf.mxu2 }
 0x130   :  { %v1139_v43 = vadd.f32 %v1138_v41, %v1010_v40 }
 0x131   :  { %v1012_v47 = vpop.f32.mrf.mxu1 }
 0x132   :  { %v1399_v53 = vpack.c.bf16 %v1139_v43, %v1137_v42  ;;  %v1013_v63 = vadd.f32 %v1012_v47, %v883_v26  ;;  %v2516_v26 = vld [vmem:[#allocation9 + $0x28] sm:$0xff]  ;;  %v893_v40 = vpop.f32.mrf.mxu0  ;;  %v2796_v47 = vpop.f32.mrf.mxu3 }
 0x133   :  { %1761 = vmatpush.bf16.msrb.mxu0 %v2516_v26 }
 0x134   :  { %1051 = vmatmul.bf16.gmra.mxu1 %v2086_v45  ;;  %1180 = vmatmul.bf16.gmra.mxu2 %v2090_v46  ;;  %v2110_v45 = vor.u32 %v2467_v28, %v2107_v29  ;;  %v2114_v46 = vor.u32 %v2469_v32, %v2113_v31  ;;  %v2473_v29 = vld [vmem:[#allocation3 + $0x154] sm:$0xf]  ;;  %v2131_v32 = vld [vmem:[#allocation3 + $0x15c] sm:$0xf0] }
 0x135   :  { %1503 = vmatmul.bf16.gmra.mxu3 %v1399_v53 }
 0x137   :  { %v1141_v59 = vpop.f32.mrf.mxu2 }
 0x138   :  { %v1142_v11 = vadd.f32 %v1141_v59, %v1013_v63  ;;  %v2515_v63 = vld [vmem:[#allocation9 + $0x20] sm:$0xff] }
 0x139   :  { %v1014_v61 = vpop.f32.mrf.mxu1  ;;  %1762 = vmatpush.bf16.msrb.mxu0 %v2515_v63 }
 0x13a   :  { %v1015_v9 = vadd.f32 %v1014_v61, %v885_v52  ;;  %v895_v59 = vpop.f32.mrf.mxu0 }
 0x13f   :  { %v1143_v10 = vpop.f32.mrf.mxu2 }
 0x140   :  { %v1144_v12 = vadd.f32 %v1143_v10, %v1015_v9  ;;  %v2472_v9 = vld [vmem:[#allocation3 + $0x148] sm:$0xf0] }
 0x141   :  { %v1017_v16 = vpop.f32.mrf.mxu1 }
 0x142   :  { %v1400_v17 = vpack.c.bf16 %v1144_v12, %v1142_v11  ;;  %v1018_v27 = vadd.f32 %v1017_v16, %v888_v62  ;;  %v2798_v62 = vpop.f32.mrf.mxu3  ;;  %v2126_v16 = vor.u32 %v2472_v9, %v2125_v8  ;;  %v2476_v8 = vld [vmem:[#allocation3 + $0x16c] sm:$0xf]  ;;  %v2143_v9 = vld [vmem:[#allocation3 + $0x174] sm:$0xf0] }
 0x144   :  { %1056 = vmatmul.bf16.gmra.mxu1 %v2098_v13  ;;  %1185 = vmatmul.bf16.gmra.mxu2 %v2102_v14  ;;  %v2122_v14 = vor.u32 %v2470_v3, %v2119_v5  ;;  %v2512_v5 = vld [vmem:[#allocation9 + $0x8] sm:$0xff] }
 0x145   :  { %1508 = vmatmul.bf16.gmra.mxu3 %v1400_v17 }
 0x147   :  { %v1146_v24 = vpop.f32.mrf.mxu2 }
 0x148   :  { %v1147_v42 = vadd.f32 %v1146_v24, %v1018_v27 }
 0x149   :  { %v1019_v25 = vpop.f32.mrf.mxu1 }
 0x14a   :  { %v1020_v35 = vadd.f32 %v1019_v25, %v890_v22  ;;  %v898_v22 = vpop.f32.mrf.mxu0  ;;  %v2800_v24 = vpop.f32.mrf.mxu3  ;;  %v2514_v25 = vld [vmem:[#allocation9 + $0x18] sm:$0xff] }
 0x14b   :  { %1763 = vmatpush.bf16.msrb.mxu0 %v2514_v25 }
 0x14f   :  { %v1148_v41 = vpop.f32.mrf.mxu2 }
 0x150   :  { %v1149_v43 = vadd.f32 %v1148_v41, %v1020_v35  ;;  %v2137_v35 = vld [vmem:[#allocation3 + $0x158] sm:$0xf] }
 0x151   :  { %v1022_v52 = vpop.f32.mrf.mxu1 }
 0x152   :  { %v1401_v53 = vpack.c.bf16 %v1149_v43, %v1147_v42  ;;  %v1023_v0 = vadd.f32 %v1022_v52, %v893_v40  ;;  %v900_v31 = vpop.f32.mrf.mxu0  ;;  %v2475_v40 = vld [vmem:[#allocation3 + $0x160] sm:$0xf0]  ;;  %v2802_v42 = vpop.f32.mrf.mxu3  ;;  %v2134_v52 = vor.u32 %v2473_v29, %v2131_v32 }
 0x154   :  { %1061 = vmatmul.bf16.gmra.mxu1 %v2110_v45  ;;  %1190 = vmatmul.bf16.gmra.mxu2 %v2114_v46 }
 0x155   :  { %1513 = vmatmul.bf16.gmra.mxu3 %v1401_v53  ;;  %v2138_v53 = vor.u32 %v2475_v40, %v2137_v35  ;;  %v2155_v35 = vld [vmem:[#allocation3 + $0x18c] sm:$0xf0]  ;;  %v2481_v40 = vld [vmem:[#allocation3 + $0x190] sm:$0xf0] }
 0x157   :  { %v1151_v58 = vpop.f32.mrf.mxu2 }
 0x158   :  { %v1152_v12 = vadd.f32 %v1151_v58, %v1023_v0 }
 0x159   :  { %v1024_v61 = vpop.f32.mrf.mxu1 }
 0x15a   :  { %v1025_v10 = vadd.f32 %v1024_v61, %v895_v59  ;;  %v2513_v61 = vld [vmem:[#allocation9 + $0x10] sm:$0xff]  ;;  %v2804_v0 = vpop.f32.mrf.mxu3 }
 0x15b   :  { %1764 = vmatpush.bf16.msrb.mxu0 %v2513_v61 }
 0x15f   :  { %v1153_v11 = vpop.f32.mrf.mxu2  ;;  %1765 = vmatpush.bf16.msrb.mxu0 %v2512_v5 }
 0x160   :  { %v1154_v13 = vadd.f32 %v1153_v11, %v1025_v10  ;;  %v2149_v10 = vld [vmem:[#allocation3 + $0x170] sm:$0xf]  ;;  %v2478_v11 = vld [vmem:[#allocation3 + $0x178] sm:$0xf0] }
 0x161   :  { %v1027_v17 = vpop.f32.mrf.mxu1 }
 0x162   :  { %v1402_v18 = vpack.c.bf16 %v1154_v13, %v1152_v12  ;;  %v1028_v28 = vadd.f32 %v1027_v17, %v898_v22  ;;  %v2150_v22 = vor.u32 %v2478_v11, %v2149_v10  ;;  %v2173_v10 = vld [vmem:[#allocation3 + $0x1a0] sm:$0xf] }
 0x164   :  { %1066 = vmatmul.bf16.gmra.mxu1 %v2122_v14  ;;  %1195 = vmatmul.bf16.gmra.mxu2 %v2126_v16 }
 0x165   :  { %1518 = vmatmul.bf16.gmra.mxu3 %v1402_v18  ;;  %v2146_v18 = vor.u32 %v2476_v8, %v2143_v9  ;;  %v2482_v8 = vld [vmem:[#allocation3 + $0x19c] sm:$0xf]  ;;  %v2167_v9 = vld [vmem:[#allocation3 + $0x1a4] sm:$0xf0] }
 0x167   :  { %v1156_v26 = vpop.f32.mrf.mxu2 }
 0x168   :  { %v1157_v45 = vadd.f32 %v1156_v26, %v1028_v28  ;;  %v2808_v26 = vpop.f32.mrf.mxu3 }
 0x169   :  { %v1029_v27 = vpop.f32.mrf.mxu1 }
 0x16a   :  { %v1030_v41 = vadd.f32 %v1029_v27, %v900_v31  ;;  %v2511_v31 = vld [vmem:[#allocation9] sm:$0xff] }
 0x16b   :  { %1766 = vmatpush.bf16.msrb.mxu0 %v2511_v31  ;;  %v2179_v31 = vld [vmem:[#allocation3 + $0x1bc] sm:$0xf0] }
 0x16f   :  { %v1158_v43 = vpop.f32.mrf.mxu2 }
 0x170   :  { %v1159_v46 = vadd.f32 %v1158_v43, %v1030_v41  ;;  %v2810_v32 = vpop.f32.mrf.mxu3 }
 0x171   :  { %v1032_v58 = vpop.f32.mrf.mxu1 }
 0x172   :  { %v1403_v59 = vpack.c.bf16 %v1159_v46, %v1157_v45  ;;  %v1033_v12 = vadd.f32 %v1032_v58, %v2742_v37  ;;  %v2479_v37 = vld [vmem:[#allocation3 + $0x184] sm:$0xf] }
 0x174   :  { %1071 = vmatmul.bf16.gmra.mxu1 %v2134_v52  ;;  %1200 = vmatmul.bf16.gmra.mxu2 %v2138_v53  ;;  %v2158_v53 = vor.u32 %v2479_v37, %v2155_v35  ;;  %v2185_v37 = vld [vmem:[#allocation3 + $0x1b8] sm:$0xf]  ;;  %v2487_v35 = vld [vmem:[#allocation3 + $0x1c0] sm:$0xf0] }
 0x175   :  { %1523 = vmatmul.bf16.gmra.mxu3 %v1403_v59 }
 0x177   :  { %v1161_v63 = vpop.f32.mrf.mxu2 }
 0x178   :  { %v1162_v16 = vadd.f32 %v1161_v63, %v1033_v12  ;;  %v2814_v63 = vpop.f32.mrf.mxu3 }
 0x179   :  { %v1034_v3 = vpop.f32.mrf.mxu1 }
 0x17a   :  { %v1035_v13 = vadd.f32 %v1034_v3, %v2746_v39  ;;  %v2161_v39 = vld [vmem:[#allocation3 + $0x188] sm:$0xf] }
 0x17b   :  { %v2162_v58 = vor.u32 %v2481_v40, %v2161_v39 }
 0x17f   :  { %v1163_v14 = vpop.f32.mrf.mxu2 }
 0x180   :  { %v1164_v17 = vadd.f32 %v1163_v14, %v1035_v13  ;;  %v2818_v13 = vpop.f32.mrf.mxu3 }
 0x181   :  { %v1037_v25 = vpop.f32.mrf.mxu1 }
 0x182   :  { %v1404_v27 = vpack.c.bf16 %v1164_v17, %v1162_v16  ;;  %v1038_v41 = vadd.f32 %v1037_v25, %v2750_v54  ;;  %v2484_v54 = vld [vmem:[#allocation3 + $0x1a8] sm:$0xf0]  ;;  %v2170_v17 = vor.u32 %v2482_v8, %v2167_v9 }
 0x184   :  { %1076 = vmatmul.bf16.gmra.mxu1 %v2146_v18  ;;  %1205 = vmatmul.bf16.gmra.mxu2 %v2150_v22  ;;  %v2174_v18 = vor.u32 %v2484_v54, %v2173_v10  ;;  %v2488_v54 = vld [vmem:[#allocation3 + $0x1cc] sm:$0xf] }
 0x185   :  { %1528 = vmatmul.bf16.gmra.mxu3 %v1404_v27 }
 0x187   :  { %v1166_v28 = vpop.f32.mrf.mxu2 }
 0x188   :  { %v1167_v46 = vadd.f32 %v1166_v28, %v1038_v41 }
 0x189   :  { %v1039_v29 = vpop.f32.mrf.mxu1 }
 0x18a   :  { %v1040_v43 = vadd.f32 %v1039_v29, %v2754_v57 }
 0x18f   :  { %v1168_v45 = vpop.f32.mrf.mxu2 }
 0x190   :  { %v1169_v52 = vadd.f32 %v1168_v45, %v1040_v43 }
 0x191   :  { %v1042_v59 = vpop.f32.mrf.mxu1 }
 0x192   :  { %v1405_v61 = vpack.c.bf16 %v1169_v52, %v1167_v46  ;;  %v1043_v57 = vadd.f32 %v1042_v59, %v2758_v4  ;;  %v2823_v4 = vld [vmem:[%s2962_s3] ss:$0 sm:$0xff] }
 0x194   :  { %1081 = vmatmul.bf16.gmra.mxu1 %v2158_v53  ;;  %1210 = vmatmul.bf16.gmra.mxu2 %v2162_v58  ;;  %v2186_v58 = vor.u32 %v2487_v35, %v2185_v37 }
 0x195   :  { %1533 = vmatmul.bf16.gmra.mxu3 %v1405_v61 }
 0x197   :  { %v1171_v3 = vpop.f32.mrf.mxu2 }
 0x198   :  { %v1172_v14 = vadd.f32 %v1171_v3, %v1043_v57  ;;  %v2191_v57 = vld [vmem:[#allocation3 + $0x1d4] sm:$0xf0] }
 0x199   :  { %v1044_v5 = vpop.f32.mrf.mxu1 }
 0x19a   :  { %v1045_v11 = vadd.f32 %v1044_v5, %v2762_v7  ;;  %v2485_v7 = vld [vmem:[#allocation3 + $0x1b4] sm:$0xf] }
 0x19b   :  { %v2182_v53 = vor.u32 %v2485_v7, %v2179_v31 }
 0x19f   :  { %v1173_v12 = vpop.f32.mrf.mxu2 }
 0x1a0   :  { %v1174_v16 = vadd.f32 %v1173_v12, %v1045_v11  ;;  %v2197_v11 = vld [vmem:[#allocation3 + $0x1d0] sm:$0xf]  ;;  %v2490_v12 = vld [vmem:[#allocation3 + $0x1d8] sm:$0xf0] }
 0x1a1   :  { %v1047_v22 = vpop.f32.mrf.mxu1 }
 0x1a2   :  { %v1406_v25 = vpack.c.bf16 %v1174_v16, %v1172_v14  ;;  %v1048_v39 = vadd.f32 %v1047_v22, %v2766_v19 }
 0x1a4   :  { %1086 = vmatmul.bf16.gmra.mxu1 %v2170_v17  ;;  %1215 = vmatmul.bf16.gmra.mxu2 %v2174_v18 }
 0x1a5   :  { %1538 = vmatmul.bf16.gmra.mxu3 %v1406_v25 }
 0x1a7   :  { %v1176_v27 = vpop.f32.mrf.mxu2 }
 0x1a8   :  { %v1499_v28 = vpop.f32.mrf.mxu3  ;;  %v1177_v45 = vadd.f32 %v1176_v27, %v1048_v39 }
 0x1a9   :  { %v1049_v29 = vpop.f32.mrf.mxu1  ;;  %v1500_v41 = vadd.f32 %v2823_v4, %v1499_v28  ;;  %v2194_v28 = vor.u32 %v2488_v54, %v2191_v57 }
 0x1aa   :  { %v1050_v40 = vadd.f32 %v1049_v29, %v2770_v21  ;;  %v2198_v29 = vor.u32 %v2490_v12, %v2197_v11 }
 0x1ab   :  { %v1619_v5 = vmax.f32 %v1500_v41, 0.0 }
 0x1af   :  { %v1178_v43 = vpop.f32.mrf.mxu2 }
 0x1b0   :  { %v1179_v46 = vadd.f32 %v1178_v43, %v1050_v40  ;;  %v1501_v52 = vpop.f32.mrf.mxu3  ;;  %v2491_v43 = vld [vmem:[#allocation3 + $0x1e4] sm:$0xf] }
 0x1b1   :  { %v1502_v59 = vadd.f32 %v2823_v4, %v1501_v52  ;;  %v1052_v61 = vpop.f32.mrf.mxu1  ;;  %v2493_v52 = vld [vmem:[#allocation3 + $0x1f0] sm:$0xf0] }
 0x1b2   :  { %v1407_v3 = vpack.c.bf16 %v1179_v46, %v1177_v45  ;;  %v1053_v14 = vadd.f32 %v1052_v61, %v2774_v33  ;;  %v2203_v45 = vld [vmem:[#allocation3 + $0x1ec] sm:$0xf0]  ;;  %v2209_v46 = vld [vmem:[#allocation3 + $0x1e8] sm:$0xf] }
 0x1b3   :  { %v1620_v8 = vmax.f32 %v1502_v59, 0.0 }
 0x1b4   :  { %1091 = vmatmul.bf16.gmra.mxu1 %v2182_v53  ;;  %1220 = vmatmul.bf16.gmra.mxu2 %v2186_v58 }
 0x1b5   :  { %1543 = vmatmul.bf16.gmra.mxu3 %v1407_v3  ;;  %v1667_v19 = vpack.c.bf16 %v1620_v8, %v1619_v5 }
 0x1b7   :  { %1767 = vmatmul.bf16.vlgmr.msrb.gmra.mxu0 %v1667_v19  ;;  %v1181_v21 = vpop.f32.mrf.mxu2  ;;  %v2206_v19 = vor.u32 %v2491_v43, %v2203_v45 }
 0x1b8   :  { %v1504_v9 = vpop.f32.mrf.mxu3  ;;  %v1182_v22 = vadd.f32 %v1181_v21, %v1053_v14  ;;  %v2210_v21 = vor.u32 %v2493_v52, %v2209_v46  ;;  %v2497_v52 = vld [vmem:[#allocation3 + $0x214] sm:$0xf] }
 0x1b9   :  { %v1054_v10 = vpop.f32.mrf.mxu1  ;;  %v1505_v17 = vadd.f32 %v2823_v4, %v1504_v9 }
 0x1ba   :  { %v1055_v16 = vadd.f32 %v1054_v10, %v2778_v36 }
 0x1bb   :  { %v1621_v35 = vmax.f32 %v1505_v17, 0.0  ;;  %v2215_v17 = vld [vmem:[#allocation3 + $0x204] sm:$0xf0] }
 0x1bf   :  { %v1183_v18 = vpop.f32.mrf.mxu2 }
 0x1c0   :  { %v1184_v25 = vadd.f32 %v1183_v18, %v1055_v16  ;;  %v1506_v27 = vpop.f32.mrf.mxu3  ;;  %v2494_v16 = vld [vmem:[#allocation3 + $0x1fc] sm:$0xf]  ;;  %v2221_v18 = vld [vmem:[#allocation3 + $0x200] sm:$0xf] }
 0x1c1   :  { %v1507_v7 = vadd.f32 %v2823_v4, %v1506_v27  ;;  %v1057_v31 = vpop.f32.mrf.mxu1 }
 0x1c2   :  { %v1408_v37 = vpack.c.bf16 %v1184_v25, %v1182_v22  ;;  %v1058_v53 = vadd.f32 %v1057_v31, %v2782_v48  ;;  %v2496_v22 = vld [vmem:[#allocation3 + $0x208] sm:$0xf0] }
 0x1c3   :  { %v1622_v39 = vmax.f32 %v1507_v7, 0.0 }
 0x1c4   :  { %1096 = vmatmul.bf16.gmra.mxu1 %v2194_v28  ;;  %1225 = vmatmul.bf16.gmra.mxu2 %v2198_v29 }
 0x1c5   :  { %1548 = vmatmul.bf16.gmra.mxu3 %v1408_v37  ;;  %v1668_v33 = vpack.c.bf16 %v1622_v39, %v1621_v35  ;;  %v2218_v35 = vor.u32 %v2494_v16, %v2215_v17  ;;  %v2222_v39 = vor.u32 %v2496_v22, %v2221_v18  ;;  %v2500_v17 = vld [vmem:[#allocation3 + $0x22c] sm:$0xf]  ;;  %v2239_v18 = vld [vmem:[#allocation3 + $0x234] sm:$0xf0]  ;;  %v2245_v22 = vld [vmem:[#allocation3 + $0x230] sm:$0xf] }
 0x1c7   :  { %1772 = vmatmul.bf16.gmra.mxu0 %v1668_v33  ;;  %v1186_v36 = vpop.f32.mrf.mxu2 }
 0x1c8   :  { %v1509_v40 = vpop.f32.mrf.mxu3  ;;  %v1187_v3 = vadd.f32 %v1186_v36, %v1058_v53  ;;  %v2227_v53 = vld [vmem:[#allocation3 + $0x21c] sm:$0xf0] }
 0x1c9   :  { %v1059_v41 = vpop.f32.mrf.mxu1  ;;  %v1510_v59 = vadd.f32 %v2823_v4, %v1509_v40 }
 0x1ca   :  { %v1060_v58 = vadd.f32 %v1059_v41, %v2786_v50 }
 0x1cb   :  { %v1623_v57 = vmax.f32 %v1510_v59, 0.0  ;;  %v2499_v59 = vld [vmem:[#allocation3 + $0x220] sm:$0xf0] }
 0x1cf   :  { %v1188_v61 = vpop.f32.mrf.mxu2 }
 0x1d0   :  { %v1189_v5 = vadd.f32 %v1188_v61, %v1060_v58  ;;  %v1511_v8 = vpop.f32.mrf.mxu3  ;;  %v2233_v58 = vld [vmem:[#allocation3 + $0x218] sm:$0xf] }
 0x1d1   :  { %v1512_v9 = vadd.f32 %v2823_v4, %v1511_v8  ;;  %v1062_v10 = vpop.f32.mrf.mxu1 }
 0x1d2   :  { %v1409_v54 = vpack.c.bf16 %v1189_v5, %v1187_v3  ;;  %v1063_v25 = vadd.f32 %v1062_v10, %v2744_v38  ;;  %v2230_v10 = vor.u32 %v2497_v52, %v2227_v53 }
 0x1d3   :  { %v1624_v11 = vmax.f32 %v1512_v9, 0.0 }
 0x1d4   :  { %1101 = vmatmul.bf16.gmra.mxu1 %v2206_v19  ;;  %1230 = vmatmul.bf16.gmra.mxu2 %v2210_v21 }
 0x1d5   :  { %1553 = vmatmul.bf16.gmra.mxu3 %v1409_v54  ;;  %v1669_v48 = vpack.c.bf16 %v1624_v11, %v1623_v57  ;;  %v2234_v54 = vor.u32 %v2499_v59, %v2233_v58 }
 0x1d7   :  { %1777 = vmatmul.bf16.gmra.mxu0 %v1669_v48  ;;  %v1191_v50 = vpop.f32.mrf.mxu2 }
 0x1d8   :  { %v1514_v12 = vpop.f32.mrf.mxu3  ;;  %v1192_v7 = vadd.f32 %v1191_v50, %v1063_v25  ;;  %v2502_v25 = vld [vmem:[#allocation3 + $0x238] sm:$0xf0] }
 0x1d9   :  { %v1064_v14 = vpop.f32.mrf.mxu1  ;;  %v1515_v28 = vadd.f32 %v2823_v4, %v1514_v12 }
 0x1da   :  { %v1065_v27 = vadd.f32 %v1064_v14, %v2748_v51 }
 0x1db   :  { %v1625_v41 = vmax.f32 %v1515_v28, 0.0 }
 0x1df   :  { %v1193_v29 = vpop.f32.mrf.mxu2 }
 0x1e0   :  { %v1194_v31 = vadd.f32 %v1193_v29, %v1065_v27  ;;  %v1516_v37 = vpop.f32.mrf.mxu3 }
 0x1e1   :  { %v1517_v33 = vadd.f32 %v2823_v4, %v1516_v37  ;;  %v1067_v36 = vpop.f32.mrf.mxu1 }
 0x1e2   :  { %v1410_v40 = vpack.c.bf16 %v1194_v31, %v1192_v7  ;;  %v1068_v61 = vadd.f32 %v1067_v36, %v2752_v55 }
 0x1e3   :  { %v1626_v43 = vmax.f32 %v1517_v33, 0.0  ;;  %v2246_v33 = vor.u32 %v2502_v25, %v2245_v22 }
 0x1e4   :  { %1106 = vmatmul.bf16.gmra.mxu1 %v2218_v35  ;;  %1235 = vmatmul.bf16.gmra.mxu2 %v2222_v39  ;;  %v2242_v39 = vor.u32 %v2500_v17, %v2239_v18 }
 0x1e5   :  { %1558 = vmatmul.bf16.gmra.mxu3 %v1410_v40  ;;  %v1670_v38 = vpack.c.bf16 %v1626_v43, %v1625_v41 }
 0x1e7   :  { %1782 = vmatmul.bf16.gmra.mxu0 %v1670_v38  ;;  %v1196_v51 = vpop.f32.mrf.mxu2 }
 0x1e8   :  { %v1519_v45 = vpop.f32.mrf.mxu3  ;;  %v1197_v19 = vadd.f32 %v1196_v51, %v1068_v61 }
 0x1e9   :  { %v1069_v46 = vpop.f32.mrf.mxu1  ;;  %v1520_v5 = vadd.f32 %v2823_v4, %v1519_v45 }
 0x1ea   :  { %v1070_v3 = vadd.f32 %v1069_v46, %v2756_v1 }
 0x1eb   :  { %v1627_v50 = vmax.f32 %v1520_v5, 0.0 }
 0x1ef   :  { %v1198_v8 = vpop.f32.mrf.mxu2 }
 0x1f0   :  { %v1199_v21 = vadd.f32 %v1198_v8, %v1070_v3  ;;  %v1521_v9 = vpop.f32.mrf.mxu3 }
 0x1f1   :  { %v1522_v57 = vadd.f32 %v2823_v4, %v1521_v9  ;;  %v1072_v11 = vpop.f32.mrf.mxu1 }
 0x1f2   :  { %v1411_v48 = vpack.c.bf16 %v1199_v21, %v1197_v19  ;;  %v1073_v27 = vadd.f32 %v1072_v11, %v2760_v6 }
 0x1f3   :  { %v1628_v12 = vmax.f32 %v1522_v57, 0.0 }
 0x1f4   :  { %1111 = vmatmul.bf16.gmra.mxu1 %v2230_v10  ;;  %1240 = vmatmul.bf16.gmra.mxu2 %v2234_v54 }
 0x1f5   :  { %1563 = vmatmul.bf16.gmra.mxu3 %v1411_v48  ;;  %v1671_v55 = vpack.c.bf16 %v1628_v12, %v1627_v50 }
 0x1f7   :  { %1787 = vmatmul.bf16.gmra.mxu0 %v1671_v55  ;;  %v1201_v1 = vpop.f32.mrf.mxu2 }
 0x1f8   :  { %v1524_v14 = vpop.f32.mrf.mxu3  ;;  %v1202_v31 = vadd.f32 %v1201_v1, %v1073_v27 }
 0x1f9   :  { %v1074_v16 = vpop.f32.mrf.mxu1  ;;  %v1525_v29 = vadd.f32 %v2823_v4, %v1524_v14 }
 0x1fa   :  { %v1075_v28 = vadd.f32 %v1074_v16, %v2764_v15 }
 0x1fb   :  { %v1629_v43 = vmax.f32 %v1525_v29, 0.0 }
 0x1ff   :  { %v1203_v7 = vpop.f32.mrf.mxu2 }
 0x200   :  { %v1204_v37 = vadd.f32 %v1203_v7, %v1075_v28  ;;  %v1526_v35 = vpop.f32.mrf.mxu3 }
 0x201   :  { %v1527_v36 = vadd.f32 %v2823_v4, %v1526_v35  ;;  %v1077_v40 = vpop.f32.mrf.mxu1 }
 0x202   :  { %v1412_v41 = vpack.c.bf16 %v1204_v37, %v1202_v31  ;;  %v1078_v46 = vadd.f32 %v1077_v40, %v2768_v20  ;;  %v2864_v40 = vld [vmem:[%s2964_s5] ss:$0 sm:$0xff]  ;;  %s2692_s5 = smov [#allocation11]  }
 0x203   :  { %v1630_v38 = vmax.f32 %v1527_v36, 0.0  ;;  %s1940_s20 = sshll.u32 %s2692_s5, 4  ;;  %s1941_s20 = int_to_ptr.vmem [resolvable:$true] %s1940_s20 }
 0x204   :  { %1116 = vmatmul.bf16.gmra.mxu1 %v2242_v39  ;;  %1245 = vmatmul.bf16.gmra.mxu2 %v2246_v33 }
 0x205   :  { %1568 = vmatmul.bf16.gmra.mxu3 %v1412_v41  ;;  %v1672_v6 = vpack.c.bf16 %v1630_v38, %v1629_v43 }
 0x207   :  { %1792 = vmatmul.bf16.gmra.mxu0 %v1672_v6  ;;  %v1206_v15 = vpop.f32.mrf.mxu2 }
 0x208   :  { %v1529_v51 = vpop.f32.mrf.mxu3  ;;  %v1207_v59 = vadd.f32 %v1206_v15, %v1078_v46 }
 0x209   :  { %v1079_v45 = vpop.f32.mrf.mxu1  ;;  %v1530_v53 = vadd.f32 %v2823_v4, %v1529_v51 }
 0x20a   :  { %v1080_v52 = vadd.f32 %v1079_v45, %v2772_v30 }
 0x20b   :  { %v1631_v21 = vmax.f32 %v1530_v53, 0.0 }
 0x20f   :  { %v1208_v58 = vpop.f32.mrf.mxu2 }
 0x210   :  { %v1209_v61 = vadd.f32 %v1208_v58, %v1080_v52  ;;  %v1531_v3 = vpop.f32.mrf.mxu3 }
 0x211   :  { %v1532_v5 = vadd.f32 %v2823_v4, %v1531_v3  ;;  %v1082_v8 = vpop.f32.mrf.mxu1 }
 0x212   :  { %v1413_v19 = vpack.c.bf16 %v1209_v61, %v1207_v59  ;;  %v1083_v30 = vadd.f32 %v1082_v8, %v2776_v34 }
 0x213   :  { %v1632_v9 = vmax.f32 %v1532_v5, 0.0 }
 0x215   :  { %1573 = vmatmul.bf16.gmra.mxu3 %v1413_v19  ;;  %v1673_v10 = vpack.c.bf16 %v1632_v9, %v1631_v21 }
 0x217   :  { %1797 = vmatmul.bf16.gmra.mxu0 %v1673_v10  ;;  %v1211_v54 = vpop.f32.mrf.mxu2 }
 0x218   :  { %v1534_v57 = vpop.f32.mrf.mxu3  ;;  %v1212_v12 = vadd.f32 %v1211_v54, %v1083_v30 }
 0x219   :  { %v1084_v20 = vpop.f32.mrf.mxu1  ;;  %v1535_v48 = vadd.f32 %v2823_v4, %v1534_v57 }
 0x21a   :  { %v1085_v11 = vadd.f32 %v1084_v20, %v2780_v44 }
 0x21b   :  { %v1633_v18 = vmax.f32 %v1535_v48, 0.0 }
 0x21f   :  { %v1213_v50 = vpop.f32.mrf.mxu2 }
 0x220   :  { %v1214_v55 = vadd.f32 %v1213_v50, %v1085_v11  ;;  %v1536_v1 = vpop.f32.mrf.mxu3 }
 0x221   :  { %v1537_v14 = vadd.f32 %v2823_v4, %v1536_v1  ;;  %v1087_v16 = vpop.f32.mrf.mxu1 }
 0x222   :  { %v1414_v17 = vpack.c.bf16 %v1214_v55, %v1212_v12  ;;  %v1088_v44 = vadd.f32 %v1087_v16, %v2784_v49 }
 0x223   :  { %v1634_v22 = vmax.f32 %v1537_v14, 0.0 }
 0x225   :  { %1578 = vmatmul.bf16.gmra.mxu3 %v1414_v17  ;;  %v1674_v25 = vpack.c.bf16 %v1634_v22, %v1633_v18 }
 0x227   :  { %1802 = vmatmul.bf16.gmra.mxu0 %v1674_v25  ;;  %v1216_v27 = vpop.f32.mrf.mxu2 }
 0x228   :  { %v1539_v28 = vpop.f32.mrf.mxu3  ;;  %v1217_v37 = vadd.f32 %v1216_v27, %v1088_v44 }
 0x229   :  { %v1089_v34 = vpop.f32.mrf.mxu1  ;;  %v1540_v7 = vadd.f32 %v2823_v4, %v1539_v28 }
 0x22a   :  { %v1090_v29 = vadd.f32 %v1089_v34, %v2788_v60 }
 0x22b   :  { %v1635_v43 = vmax.f32 %v1540_v7, 0.0 }
 0x22f   :  { %v1218_v31 = vpop.f32.mrf.mxu2 }
 0x230   :  { %v1219_v35 = vadd.f32 %v1218_v31, %v1090_v29  ;;  %v1541_v39 = vpop.f32.mrf.mxu3 }
 0x231   :  { %v1542_v33 = vadd.f32 %v2823_v4, %v1541_v39  ;;  %v1092_v36 = vpop.f32.mrf.mxu1 }
 0x232   :  { %v1415_v41 = vpack.c.bf16 %v1219_v35, %v1217_v37  ;;  %v1093_v53 = vadd.f32 %v1092_v36, %v2790_v56 }
 0x233   :  { %v1636_v38 = vmax.f32 %v1542_v33, 0.0 }
 0x234   :  { %v1768_v49 = vpop.f32.mrf.mxu0 }
 0x235   :  { %v1769_v60 = vadd.f32 %v2864_v40, %v1768_v49  ;;  %1583 = vmatmul.bf16.gmra.mxu3 %v1415_v41  ;;  %v1675_v6 = vpack.c.bf16 %v1636_v38, %v1635_v43 }
 0x237   :  { %1888 = vst [vmem:[#allocation11] sm:$0xff] %v1769_v60  ;;  %1807 = vmatmul.bf16.gmra.mxu0 %v1675_v6  ;;  %v1221_v15 = vpop.f32.mrf.mxu2 }
 0x238   :  { %v1544_v51 = vpop.f32.mrf.mxu3  ;;  %v1222_v3 = vadd.f32 %v1221_v15, %v1093_v53 }
 0x239   :  { %v1094_v45 = vpop.f32.mrf.mxu1  ;;  %v1545_v59 = vadd.f32 %v2823_v4, %v1544_v51 }
 0x23a   :  { %v1095_v58 = vadd.f32 %v1094_v45, %v2792_v2 }
 0x23b   :  { %v1637_v10 = vmax.f32 %v1545_v59, 0.0 }
 0x23c   :  { %v1770_v46 = vpop.f32.mrf.mxu0 }
 0x23d   :  { %v1771_v52 = vadd.f32 %v2864_v40, %v1770_v46 }
 0x23f   :  { %1889 = vst [vmem:[#allocation11 + $0x8] sm:$0xff] %v1771_v52  ;;  %v1223_v61 = vpop.f32.mrf.mxu2 }
 0x240   :  { %v1224_v5 = vadd.f32 %v1223_v61, %v1095_v58  ;;  %v1546_v8 = vpop.f32.mrf.mxu3 }
 0x241   :  { %v1547_v19 = vadd.f32 %v2823_v4, %v1546_v8  ;;  %v1097_v21 = vpop.f32.mrf.mxu1 }
 0x242   :  { %v1416_v9 = vpack.c.bf16 %v1224_v5, %v1222_v3  ;;  %v1098_v12 = vadd.f32 %v1097_v21, %v2794_v23 }
 0x243   :  { %v1638_v54 = vmax.f32 %v1547_v19, 0.0 }
 0x244   :  { %v1773_v57 = vpop.f32.mrf.mxu0 }
 0x245   :  { %v1774_v20 = vadd.f32 %v2864_v40, %v1773_v57  ;;  %1588 = vmatmul.bf16.gmra.mxu3 %v1416_v9  ;;  %v1676_v56 = vpack.c.bf16 %v1638_v54, %v1637_v10 }
 0x247   :  { %1890 = vst [vmem:[#allocation11 + $0x10] sm:$0xff] %v1774_v20  ;;  %1812 = vmatmul.bf16.gmra.mxu0 %v1676_v56  ;;  %v1226_v2 = vpop.f32.mrf.mxu2 }
 0x248   :  { %v1549_v30 = vpop.f32.mrf.mxu3  ;;  %v1227_v16 = vadd.f32 %v1226_v2, %v1098_v12 }
 0x249   :  { %v1099_v11 = vpop.f32.mrf.mxu1  ;;  %v1550_v1 = vadd.f32 %v2823_v4, %v1549_v30 }
 0x24a   :  { %v1100_v55 = vadd.f32 %v1099_v11, %v2796_v47 }
 0x24b   :  { %v1639_v28 = vmax.f32 %v1550_v1, 0.0 }
 0x24c   :  { %v1775_v48 = vpop.f32.mrf.mxu0 }
 0x24d   :  { %v1776_v50 = vadd.f32 %v2864_v40, %v1775_v48 }
 0x24f   :  { %1891 = vst [vmem:[#allocation11 + $0x18] sm:$0xff] %v1776_v50  ;;  %v1228_v14 = vpop.f32.mrf.mxu2 }
 0x250   :  { %v1229_v17 = vadd.f32 %v1228_v14, %v1100_v55  ;;  %v1551_v18 = vpop.f32.mrf.mxu3 }
 0x251   :  { %v1552_v22 = vadd.f32 %v2823_v4, %v1551_v18  ;;  %v1102_v25 = vpop.f32.mrf.mxu1 }
 0x252   :  { %v1417_v27 = vpack.c.bf16 %v1229_v17, %v1227_v16  ;;  %v1103_v39 = vadd.f32 %v1102_v25, %v2798_v62 }
 0x253   :  { %v1640_v34 = vmax.f32 %v1552_v22, 0.0 }
 0x254   :  { %v1778_v44 = vpop.f32.mrf.mxu0 }
 0x255   :  { %v1779_v29 = vadd.f32 %v2864_v40, %v1778_v44  ;;  %1593 = vmatmul.bf16.gmra.mxu3 %v1417_v27  ;;  %v1677_v23 = vpack.c.bf16 %v1640_v34, %v1639_v28 }
 0x257   :  { %1892 = vst [vmem:[#allocation11 + $0x20] sm:$0xff] %v1779_v29  ;;  %1817 = vmatmul.bf16.gmra.mxu0 %v1677_v23  ;;  %v1231_v47 = vpop.f32.mrf.mxu2 }
 0x258   :  { %v1554_v7 = vpop.f32.mrf.mxu3  ;;  %v1232_v43 = vadd.f32 %v1231_v47, %v1103_v39 }
 0x259   :  { %v1104_v31 = vpop.f32.mrf.mxu1  ;;  %v1555_v36 = vadd.f32 %v2823_v4, %v1554_v7 }
 0x25a   :  { %v1105_v33 = vadd.f32 %v1104_v31, %v2800_v24 }
 0x25b   :  { %v1641_v51 = vmax.f32 %v1555_v36, 0.0 }
 0x25c   :  { %v1780_v37 = vpop.f32.mrf.mxu0 }
 0x25d   :  { %v1781_v35 = vadd.f32 %v2864_v40, %v1780_v37 }
 0x25f   :  { %1893 = vst [vmem:[#allocation11 + $0x28] sm:$0xff] %v1781_v35  ;;  %v1233_v41 = vpop.f32.mrf.mxu2 }
 0x260   :  { %v1234_v38 = vadd.f32 %v1233_v41, %v1105_v33  ;;  %v1556_v49 = vpop.f32.mrf.mxu3 }
 0x261   :  { %v1557_v60 = vadd.f32 %v2823_v4, %v1556_v49  ;;  %v1107_v6 = vpop.f32.mrf.mxu1 }
 0x262   :  { %v1418_v15 = vpack.c.bf16 %v1234_v38, %v1232_v43  ;;  %v1108_v3 = vadd.f32 %v1107_v6, %v2802_v42 }
 0x263   :  { %v1642_v45 = vmax.f32 %v1557_v60, 0.0 }
 0x264   :  { %v1783_v46 = vpop.f32.mrf.mxu0 }
 0x265   :  { %v1784_v52 = vadd.f32 %v2864_v40, %v1783_v46  ;;  %1598 = vmatmul.bf16.gmra.mxu3 %v1418_v15  ;;  %v1678_v62 = vpack.c.bf16 %v1642_v45, %v1641_v51 }
 0x267   :  { %1894 = vst [vmem:[#allocation11 + $0x30] sm:$0xff] %v1784_v52  ;;  %1822 = vmatmul.bf16.gmra.mxu0 %v1678_v62  ;;  %v1236_v24 = vpop.f32.mrf.mxu2 }
 0x268   :  { %v1559_v53 = vpop.f32.mrf.mxu3  ;;  %v1237_v21 = vadd.f32 %v1236_v24, %v1108_v3 }
 0x269   :  { %v1109_v58 = vpop.f32.mrf.mxu1  ;;  %v1560_v8 = vadd.f32 %v2823_v4, %v1559_v53 }
 0x26a   :  { %v1110_v5 = vadd.f32 %v1109_v58, %v2804_v0 }
 0x26b   :  { %v1643_v56 = vmax.f32 %v1560_v8, 0.0 }
 0x26c   :  { %v1785_v59 = vpop.f32.mrf.mxu0 }
 0x26d   :  { %v1786_v61 = vadd.f32 %v2864_v40, %v1785_v59 }
 0x26f   :  { %1895 = vst [vmem:[#allocation11 + $0x38] sm:$0xff] %v1786_v61  ;;  %v1238_v19 = vpop.f32.mrf.mxu2 }
 0x270   :  { %v1239_v9 = vadd.f32 %v1238_v19, %v1110_v5  ;;  %v1561_v10 = vpop.f32.mrf.mxu3 }
 0x271   :  { %v1562_v54 = vadd.f32 %v2823_v4, %v1561_v10  ;;  %v1112_v57 = vpop.f32.mrf.mxu1 }
 0x272   :  { %v1419_v20 = vpack.c.bf16 %v1239_v9, %v1237_v21  ;;  %v1113_v1 = vadd.f32 %v1112_v57, %v2808_v26 }
 0x273   :  { %v1644_v2 = vmax.f32 %v1562_v54, 0.0 }
 0x274   :  { %v1788_v30 = vpop.f32.mrf.mxu0 }
 0x275   :  { %v1679_v11 = vpack.c.bf16 %v1644_v2, %v1643_v56  ;;  %v1789_v48 = vadd.f32 %v2864_v40, %v1788_v30  ;;  %1603 = vmatmul.bf16.gmra.mxu3 %v1419_v20 }
 0x277   :  { %1896 = vst [vmem:[#allocation11 + $0x40] sm:$0xff] %v1789_v48  ;;  %1827 = vmatmul.bf16.gmra.mxu0 %v1679_v11  ;;  %v1241_v42 = vpop.f32.mrf.mxu2 }
 0x278   :  { %v1564_v0 = vpop.f32.mrf.mxu3  ;;  %v1242_v18 = vadd.f32 %v1241_v42, %v1113_v1 }
 0x279   :  { %v1114_v50 = vpop.f32.mrf.mxu1  ;;  %v1565_v16 = vadd.f32 %v2823_v4, %v1564_v0 }
 0x27a   :  { %v1115_v14 = vadd.f32 %v1114_v50, %v2810_v32 }
 0x27b   :  { %v1645_v44 = vmax.f32 %v1565_v16, 0.0 }
 0x27c   :  { %v1790_v12 = vpop.f32.mrf.mxu0 }
 0x27d   :  { %v1791_v55 = vadd.f32 %v2864_v40, %v1790_v12 }
 0x27f   :  { %1897 = vst [vmem:[#allocation11 + $0x48] sm:$0xff] %v1791_v55  ;;  %v1243_v17 = vpop.f32.mrf.mxu2 }
 0x280   :  { %v1244_v22 = vadd.f32 %v1243_v17, %v1115_v14  ;;  %v1566_v25 = vpop.f32.mrf.mxu3 }
 0x281   :  { %v1567_v27 = vadd.f32 %v2823_v4, %v1566_v25  ;;  %v1117_v28 = vpop.f32.mrf.mxu1 }
 0x282   :  { %v1420_v34 = vpack.c.bf16 %v1244_v22, %v1242_v18  ;;  %v1118_v39 = vadd.f32 %v1117_v28, %v2814_v63 }
 0x283   :  { %v1646_v29 = vmax.f32 %v1567_v27, 0.0 }
 0x284   :  { %v1793_v23 = vpop.f32.mrf.mxu0 }
 0x285   :  { %v1680_v47 = vpack.c.bf16 %v1646_v29, %v1645_v44  ;;  %v1794_v7 = vadd.f32 %v2864_v40, %v1793_v23  ;;  %1608 = vmatmul.bf16.gmra.mxu3 %v1420_v34 }
 0x287   :  { %1898 = vst [vmem:[#allocation11 + $0x50] sm:$0xff] %v1794_v7  ;;  %1832 = vmatmul.bf16.gmra.mxu0 %v1680_v47  ;;  %v1246_v26 = vpop.f32.mrf.mxu2 }
 0x288   :  { %v1569_v32 = vpop.f32.mrf.mxu3  ;;  %v1247_v43 = vadd.f32 %v1246_v26, %v1118_v39 }
 0x289   :  { %v1119_v31 = vpop.f32.mrf.mxu1  ;;  %v1570_v36 = vadd.f32 %v2823_v4, %v1569_v32 }
 0x28a   :  { %v1120_v33 = vadd.f32 %v1119_v31, %v2818_v13 }
 0x28b   :  { %v1647_v15 = vmax.f32 %v1570_v36, 0.0 }
 0x28c   :  { %v1795_v37 = vpop.f32.mrf.mxu0 }
 0x28d   :  { %v1796_v35 = vadd.f32 %v2864_v40, %v1795_v37 }
 0x28f   :  { %1899 = vst [vmem:[#allocation11 + $0x58] sm:$0xff] %v1796_v35  ;;  %v1248_v41 = vpop.f32.mrf.mxu2 }
 0x290   :  { %v1249_v38 = vadd.f32 %v1248_v41, %v1120_v33  ;;  %v1571_v49 = vpop.f32.mrf.mxu3 }
 0x291   :  { %v1572_v60 = vadd.f32 %v2823_v4, %v1571_v49 }
 0x292   :  { %v1421_v6 = vpack.c.bf16 %v1249_v38, %v1247_v43 }
 0x293   :  { %v1648_v51 = vmax.f32 %v1572_v60, 0.0 }
 0x294   :  { %v1798_v45 = vpop.f32.mrf.mxu0 }
 0x295   :  { %v1681_v46 = vpack.c.bf16 %v1648_v51, %v1647_v15  ;;  %v1799_v52 = vadd.f32 %v2864_v40, %v1798_v45  ;;  %1613 = vmatmul.bf16.gmra.mxu3 %v1421_v6 }
 0x297   :  { %1900 = vst [vmem:[#allocation11 + $0x60] sm:$0xff] %v1799_v52  ;;  %1837 = vmatmul.bf16.gmra.mxu0 %v1681_v46 }
 0x298   :  { %v1574_v63 = vpop.f32.mrf.mxu3 }
 0x299   :  { %v1575_v24 = vadd.f32 %v2823_v4, %v1574_v63 }
 0x29b   :  { %v1649_v59 = vmax.f32 %v1575_v24, 0.0 }
 0x29c   :  { %v1800_v13 = vpop.f32.mrf.mxu0 }
 0x29d   :  { %v1801_v62 = vadd.f32 %v2864_v40, %v1800_v13 }
 0x29f   :  { %1901 = vst [vmem:[#allocation11 + $0x68] sm:$0xff] %v1801_v62 }
 0x2a0   :  { %v1576_v53 = vpop.f32.mrf.mxu3 }
 0x2a1   :  { %v1577_v58 = vadd.f32 %v2823_v4, %v1576_v53 }
 0x2a3   :  { %v1650_v61 = vmax.f32 %v1577_v58, 0.0 }
 0x2a4   :  { %v1803_v3 = vpop.f32.mrf.mxu0 }
 0x2a5   :  { %v1682_v5 = vpack.c.bf16 %v1650_v61, %v1649_v59  ;;  %v1804_v8 = vadd.f32 %v2864_v40, %v1803_v3 }
 0x2a7   :  { %1902 = vst [vmem:[#allocation11 + $0x70] sm:$0xff] %v1804_v8  ;;  %1842 = vmatmul.bf16.gmra.mxu0 %v1682_v5 }
 0x2a8   :  { %v1579_v19 = vpop.f32.mrf.mxu3 }
 0x2a9   :  { %v1580_v10 = vadd.f32 %v2823_v4, %v1579_v19 }
 0x2ab   :  { %v1651_v20 = vmax.f32 %v1580_v10, 0.0 }
 0x2ac   :  { %v1805_v21 = vpop.f32.mrf.mxu0 }
 0x2ad   :  { %v1806_v9 = vadd.f32 %v2864_v40, %v1805_v21 }
 0x2af   :  { %1903 = vst [vmem:[#allocation11 + $0x78] sm:$0xff] %v1806_v9 }
 0x2b0   :  { %v1581_v54 = vpop.f32.mrf.mxu3 }
 0x2b1   :  { %v1582_v57 = vadd.f32 %v2823_v4, %v1581_v54 }
 0x2b3   :  { %v1652_v56 = vmax.f32 %v1582_v57, 0.0 }
 0x2b4   :  { %v1808_v2 = vpop.f32.mrf.mxu0 }
 0x2b5   :  { %v1683_v30 = vpack.c.bf16 %v1652_v56, %v1651_v20  ;;  %v1809_v11 = vadd.f32 %v2864_v40, %v1808_v2 }
 0x2b7   :  { %1904 = vst [vmem:[#allocation11 + $0x80] sm:$0xff] %v1809_v11  ;;  %1847 = vmatmul.bf16.gmra.mxu0 %v1683_v30 }
 0x2b8   :  { %v1584_v48 = vpop.f32.mrf.mxu3 }
 0x2b9   :  { %v1585_v50 = vadd.f32 %v2823_v4, %v1584_v48 }
 0x2bb   :  { %v1653_v1 = vmax.f32 %v1585_v50, 0.0 }
 0x2bc   :  { %v1810_v42 = vpop.f32.mrf.mxu0 }
 0x2bd   :  { %v1811_v0 = vadd.f32 %v2864_v40, %v1810_v42 }
 0x2bf   :  { %1905 = vst [vmem:[#allocation11 + $0x88] sm:$0xff] %v1811_v0 }
 0x2c0   :  { %v1586_v12 = vpop.f32.mrf.mxu3 }
 0x2c1   :  { %v1587_v55 = vadd.f32 %v2823_v4, %v1586_v12 }
 0x2c3   :  { %v1654_v14 = vmax.f32 %v1587_v55, 0.0 }
 0x2c4   :  { %v1813_v16 = vpop.f32.mrf.mxu0 }
 0x2c5   :  { %v1684_v17 = vpack.c.bf16 %v1654_v14, %v1653_v1  ;;  %v1814_v18 = vadd.f32 %v2864_v40, %v1813_v16 }
 0x2c7   :  { %1906 = vst [vmem:[#allocation11 + $0x90] sm:$0xff] %v1814_v18  ;;  %1852 = vmatmul.bf16.gmra.mxu0 %v1684_v17 }
 0x2c8   :  { %v1589_v22 = vpop.f32.mrf.mxu3 }
 0x2c9   :  { %v1590_v28 = vadd.f32 %v2823_v4, %v1589_v22 }
 0x2cb   :  { %v1655_v29 = vmax.f32 %v1590_v28, 0.0 }
 0x2cc   :  { %v1815_v25 = vpop.f32.mrf.mxu0 }
 0x2cd   :  { %v1816_v27 = vadd.f32 %v2864_v40, %v1815_v25 }
 0x2cf   :  { %1907 = vst [vmem:[#allocation11 + $0x98] sm:$0xff] %v1816_v27 }
 0x2d0   :  { %v1591_v34 = vpop.f32.mrf.mxu3 }
 0x2d1   :  { %v1592_v44 = vadd.f32 %v2823_v4, %v1591_v34 }
 0x2d3   :  { %v1656_v23 = vmax.f32 %v1592_v44, 0.0 }
 0x2d4   :  { %v1818_v47 = vpop.f32.mrf.mxu0 }
 0x2d5   :  { %v1685_v7 = vpack.c.bf16 %v1656_v23, %v1655_v29  ;;  %v1819_v26 = vadd.f32 %v2864_v40, %v1818_v47 }
 0x2d7   :  { %1908 = vst [vmem:[#allocation11 + $0xa0] sm:$0xff] %v1819_v26  ;;  %1857 = vmatmul.bf16.gmra.mxu0 %v1685_v7 }
 0x2d8   :  { %v1594_v32 = vpop.f32.mrf.mxu3 }
 0x2d9   :  { %v1595_v35 = vadd.f32 %v2823_v4, %v1594_v32 }
 0x2db   :  { %v1657_v36 = vmax.f32 %v1595_v35, 0.0 }
 0x2dc   :  { %v1820_v31 = vpop.f32.mrf.mxu0 }
 0x2dd   :  { %v1821_v37 = vadd.f32 %v2864_v40, %v1820_v31 }
 0x2df   :  { %1909 = vst [vmem:[#allocation11 + $0xa8] sm:$0xff] %v1821_v37 }
 0x2e0   :  { %v1596_v39 = vpop.f32.mrf.mxu3 }
 0x2e1   :  { %v1597_v33 = vadd.f32 %v2823_v4, %v1596_v39 }
 0x2e3   :  { %v1658_v41 = vmax.f32 %v1597_v33, 0.0 }
 0x2e4   :  { %v1823_v43 = vpop.f32.mrf.mxu0 }
 0x2e5   :  { %v1686_v38 = vpack.c.bf16 %v1658_v41, %v1657_v36  ;;  %v1824_v49 = vadd.f32 %v2864_v40, %v1823_v43 }
 0x2e7   :  { %1910 = vst [vmem:[#allocation11 + $0xb0] sm:$0xff] %v1824_v49  ;;  %1862 = vmatmul.bf16.gmra.mxu0 %v1686_v38 }
 0x2e8   :  { %v1599_v60 = vpop.f32.mrf.mxu3 }
 0x2e9   :  { %v1600_v51 = vadd.f32 %v2823_v4, %v1599_v60 }
 0x2eb   :  { %v1659_v52 = vmax.f32 %v1600_v51, 0.0 }
 0x2ec   :  { %v1825_v6 = vpop.f32.mrf.mxu0 }
 0x2ed   :  { %v1826_v15 = vadd.f32 %v2864_v40, %v1825_v6 }
 0x2ef   :  { %1911 = vst [vmem:[#allocation11 + $0xb8] sm:$0xff] %v1826_v15 }
 0x2f0   :  { %v1601_v45 = vpop.f32.mrf.mxu3 }
 0x2f1   :  { %v1602_v46 = vadd.f32 %v2823_v4, %v1601_v45 }
 0x2f3   :  { %v1660_v63 = vmax.f32 %v1602_v46, 0.0 }
 0x2f4   :  { %v1828_v13 = vpop.f32.mrf.mxu0 }
 0x2f5   :  { %v1687_v62 = vpack.c.bf16 %v1660_v63, %v1659_v52  ;;  %v1829_v24 = vadd.f32 %v2864_v40, %v1828_v13 }
 0x2f7   :  { %1912 = vst [vmem:[#allocation11 + $0xc0] sm:$0xff] %v1829_v24  ;;  %1867 = vmatmul.bf16.gmra.mxu0 %v1687_v62 }
 0x2f8   :  { %v1604_v53 = vpop.f32.mrf.mxu3 }
 0x2f9   :  { %v1605_v61 = vadd.f32 %v2823_v4, %v1604_v53 }
 0x2fb   :  { %v1661_v8 = vmax.f32 %v1605_v61, 0.0 }
 0x2fc   :  { %v1830_v58 = vpop.f32.mrf.mxu0 }
 0x2fd   :  { %v1831_v59 = vadd.f32 %v2864_v40, %v1830_v58 }
 0x2ff   :  { %1913 = vst [vmem:[#allocation11 + $0xc8] sm:$0xff] %v1831_v59 }
 0x300   :  { %v1606_v3 = vpop.f32.mrf.mxu3 }
 0x301   :  { %v1607_v5 = vadd.f32 %v2823_v4, %v1606_v3 }
 0x303   :  { %v1662_v19 = vmax.f32 %v1607_v5, 0.0 }
 0x304   :  { %v1833_v21 = vpop.f32.mrf.mxu0 }
 0x305   :  { %v1688_v9 = vpack.c.bf16 %v1662_v19, %v1661_v8  ;;  %v1834_v10 = vadd.f32 %v2864_v40, %v1833_v21 }
 0x307   :  { %1914 = vst [vmem:[#allocation11 + $0xd0] sm:$0xff] %v1834_v10  ;;  %1872 = vmatmul.bf16.gmra.mxu0 %v1688_v9 }
 0x308   :  { %v1609_v54 = vpop.f32.mrf.mxu3 }
 0x309   :  { %v1610_v56 = vadd.f32 %v2823_v4, %v1609_v54 }
 0x30b   :  { %v1663_v11 = vmax.f32 %v1610_v56, 0.0 }
 0x30c   :  { %v1835_v57 = vpop.f32.mrf.mxu0 }
 0x30d   :  { %v1836_v20 = vadd.f32 %v2864_v40, %v1835_v57 }
 0x30f   :  { %1915 = vst [vmem:[#allocation11 + $0xd8] sm:$0xff] %v1836_v20 }
 0x310   :  { %v1611_v2 = vpop.f32.mrf.mxu3 }
 0x311   :  { %v1612_v30 = vadd.f32 %v2823_v4, %v1611_v2 }
 0x313   :  { %v1664_v48 = vmax.f32 %v1612_v30, 0.0 }
 0x314   :  { %v1838_v42 = vpop.f32.mrf.mxu0 }
 0x315   :  { %v1689_v0 = vpack.c.bf16 %v1664_v48, %v1663_v11  ;;  %v1839_v50 = vadd.f32 %v2864_v40, %v1838_v42 }
 0x317   :  { %1916 = vst [vmem:[#allocation11 + $0xe0] sm:$0xff] %v1839_v50  ;;  %1877 = vmatmul.bf16.gmra.mxu0 %v1689_v0 }
 0x318   :  { %v1614_v12 = vpop.f32.mrf.mxu3 }
 0x319   :  { %v1615_v14 = vadd.f32 %v2823_v4, %v1614_v12 }
 0x31b   :  { %v1665_v18 = vmax.f32 %v1615_v14, 0.0 }
 0x31c   :  { %v1840_v55 = vpop.f32.mrf.mxu0 }
 0x31d   :  { %v1841_v1 = vadd.f32 %v2864_v40, %v1840_v55 }
 0x31f   :  { %1917 = vst [vmem:[#allocation11 + $0xe8] sm:$0xff] %v1841_v1 }
 0x320   :  { %v1616_v16 = vpop.f32.mrf.mxu3 }
 0x321   :  { %v1617_v17 = vadd.f32 %v2823_v4, %v1616_v16 }
 0x323   :  { %v1666_v22 = vmax.f32 %v1617_v17, 0.0 }
 0x324   :  { %v1843_v25 = vpop.f32.mrf.mxu0 }
 0x325   :  { %v1690_v27 = vpack.c.bf16 %v1666_v22, %v1665_v18  ;;  %v1844_v28 = vadd.f32 %v2864_v40, %v1843_v25 }
 0x327   :  { %1918 = vst [vmem:[#allocation11 + $0xf0] sm:$0xff] %v1844_v28  ;;  %1882 = vmatmul.bf16.gmra.mxu0 %v1690_v27 }
 0x32c   :  { %v1845_v34 = vpop.f32.mrf.mxu0 }
 0x32d   :  { %v1846_v44 = vadd.f32 %v2864_v40, %v1845_v34 }
 0x32f   :  { %1919 = vst [vmem:[#allocation11 + $0xf8] sm:$0xff] %v1846_v44 }
 0x334   :  { %v1848_v29 = vpop.f32.mrf.mxu0 }
 0x335   :  { %v1849_v23 = vadd.f32 %v2864_v40, %v1848_v29 }
 0x337   :  { %1920 = vst [vmem:[#allocation11 + $0x100] sm:$0xff] %v1849_v23 }
 0x33c   :  { %v1850_v47 = vpop.f32.mrf.mxu0 }
 0x33d   :  { %v1851_v7 = vadd.f32 %v2864_v40, %v1850_v47 }
 0x33f   :  { %1921 = vst [vmem:[#allocation11 + $0x108] sm:$0xff] %v1851_v7 }
 0x344   :  { %v1853_v4 = vpop.f32.mrf.mxu0 }
 0x345   :  { %v1854_v26 = vadd.f32 %v2864_v40, %v1853_v4 }
 0x347   :  { %1922 = vst [vmem:[#allocation11 + $0x110] sm:$0xff] %v1854_v26 }
 0x34c   :  { %v1855_v32 = vpop.f32.mrf.mxu0 }
 0x34d   :  { %v1856_v31 = vadd.f32 %v2864_v40, %v1855_v32 }
 0x34f   :  { %1923 = vst [vmem:[#allocation11 + $0x118] sm:$0xff] %v1856_v31 }
 0x354   :  { %v1858_v37 = vpop.f32.mrf.mxu0 }
 0x355   :  { %v1859_v35 = vadd.f32 %v2864_v40, %v1858_v37 }
 0x357   :  { %1924 = vst [vmem:[#allocation11 + $0x120] sm:$0xff] %v1859_v35 }
 0x35c   :  { %v1860_v39 = vpop.f32.mrf.mxu0 }
 0x35d   :  { %v1861_v33 = vadd.f32 %v2864_v40, %v1860_v39 }
 0x35f   :  { %1925 = vst [vmem:[#allocation11 + $0x128] sm:$0xff] %v1861_v33 }
 0x364   :  { %v1863_v36 = vpop.f32.mrf.mxu0 }
 0x365   :  { %v1864_v41 = vadd.f32 %v2864_v40, %v1863_v36 }
 0x367   :  { %1926 = vst [vmem:[#allocation11 + $0x130] sm:$0xff] %v1864_v41 }
 0x36c   :  { %v1865_v43 = vpop.f32.mrf.mxu0 }
 0x36d   :  { %v1866_v38 = vadd.f32 %v2864_v40, %v1865_v43 }
 0x36f   :  { %1927 = vst [vmem:[#allocation11 + $0x138] sm:$0xff] %v1866_v38 }
 0x374   :  { %v1868_v49 = vpop.f32.mrf.mxu0 }
 0x375   :  { %v1869_v60 = vadd.f32 %v2864_v40, %v1868_v49 }
 0x377   :  { %1928 = vst [vmem:[#allocation11 + $0x140] sm:$0xff] %v1869_v60 }
 0x37c   :  { %v1870_v6 = vpop.f32.mrf.mxu0 }
 0x37d   :  { %v1871_v15 = vadd.f32 %v2864_v40, %v1870_v6 }
 0x37f   :  { %1929 = vst [vmem:[#allocation11 + $0x148] sm:$0xff] %v1871_v15 }
 0x384   :  { %v1873_v51 = vpop.f32.mrf.mxu0 }
 0x385   :  { %v1874_v45 = vadd.f32 %v2864_v40, %v1873_v51 }
 0x387   :  { %1930 = vst [vmem:[#allocation11 + $0x150] sm:$0xff] %v1874_v45 }
 0x38c   :  { %v1875_v46 = vpop.f32.mrf.mxu0 }
 0x38d   :  { %v1876_v52 = vadd.f32 %v2864_v40, %v1875_v46 }
 0x38f   :  { %1931 = vst [vmem:[#allocation11 + $0x158] sm:$0xff] %v1876_v52 }
 0x394   :  { %v1878_v63 = vpop.f32.mrf.mxu0 }
 0x395   :  { %v1879_v13 = vadd.f32 %v2864_v40, %v1878_v63 }
 0x397   :  { %1932 = vst [vmem:[#allocation11 + $0x160] sm:$0xff] %v1879_v13 }
 0x39c   :  { %v1880_v62 = vpop.f32.mrf.mxu0 }
 0x39d   :  { %v1881_v24 = vadd.f32 %v2864_v40, %v1880_v62 }
 0x39f   :  { %1933 = vst [vmem:[#allocation11 + $0x168] sm:$0xff] %v1881_v24 }
 0x3a4   :  { %v1883_v53 = vpop.f32.mrf.mxu0 }
 0x3a5   :  { %v1884_v58 = vadd.f32 %v2864_v40, %v1883_v53 }
 0x3a7   :  { %1934 = vst [vmem:[#allocation11 + $0x170] sm:$0xff] %v1884_v58 }
 0x3ac   :  { %v1885_v59 = vpop.f32.mrf.mxu0 }
 0x3ad   :  { %v1886_v61 = vadd.f32 %v2864_v40, %v1885_v59 }
 0x3af   :  { %1935 = vst [vmem:[#allocation11 + $0x178] sm:$0xff] %v1886_v61 }
 0x3b0   :  { %1948 = dma.vmem_to_hbm [thread:$0]  %s1941_s20, 6144, %s1943_s23, [#allocation5], %s2693_s24, %s2693_s24, %s2694_s25  }
 0x3b1   :  { %2682 = dma.done.wait [#allocation5], 6144  }
 0x3b2   :  { %2683 = vsyncadd [#allocation5], 4294961152 }
 0x3b3   :  { %1953 = vsyncpa [#allocation4], 1 }
 0x3b4   :  { %1954 = vsyncpa [#allocation7], 1 }
 0x3b5   :  { %1955 = vsyncpa [#allocation10], 1 }
 0x3b6   :  { %1956 = vsyncpa [#allocation5], 1 }

</bundles_post_ra>
